<compile_context>
chip_gen: v5e
topology: v5e:2x2
jax: 0.10.0
libtpu: 0.0.40
codegen_flags: <defaults>
</compile_context>

<pallas_src>
import jax
import jax.numpy as jnp
from jax import lax
from jax.experimental import pallas as pl
from jax.experimental.pallas import tpu as pltpu

_VMEM_LIMIT = 48 * 1024 * 1024   # < 64 MiB physical on v7x, < 128 MiB on v5e/v6e
_FLAT_PAD = 8                    # slack so the worst-case tap slab never reads past the image
FC_TK = 2048                     # fc1 contraction (K) tile, multiple of 128


def _largest_divisor_at_most(n, cap):
    for d in range(min(n, cap), 0, -1):
        if n % d == 0:
            return d
    return 1


# ----------------------------------------------------------------------------
# Conv2d(3x3, stride 1, VALID) + ReLU.
# Grid = (batch, row_tile).  Input arrives flattened to (H*W + pad, Cin) so each
# of the 9 taps is a single contiguous (TH*W, Cin) slab -> one MXU matmul.
# The wide accumulator (rows of width W, last 2 cols invalid) is staged in a VMEM
# scratch and cropped to Wo per row on the way to the output block.
# ----------------------------------------------------------------------------
def _conv3x3_relu_kernel(xf_ref, w_ref, b_ref, o_ref, wide_ref):
    # xf_ref: (1, H*Wi + pad, Cin)  flattened image of batch n
    # w_ref : (3, 3, Cin, Cout)     HWIO
    # b_ref : (1, Cout)
    # o_ref : (1, TH, Wo, Cout)     TH output rows for this grid step
    # wide  : (TH*Wi, Cout) f32     un-cropped conv rows
    t = pl.program_id(1)
    TH, Wo, Cout = o_ref.shape[1], o_ref.shape[2], o_ref.shape[3]
    Cin = xf_ref.shape[2]
    Wi = Wo + 2                     # input row width
    L = TH * Wi                     # wide row-tile length
    base = t * L                    # flat offset of input row t*TH, col 0

    acc = jnp.zeros((L, Cout), jnp.float32)
    for dy in range(3):
        row_base = base + dy * Wi
        for dx in range(3):
            slab = xf_ref[0, pl.ds(row_base + dx, L), :]        # (L, Cin), contiguous
            wk = w_ref[dy, dx]                                  # (Cin, Cout)
            if Cin == 1:
                acc = acc + slab * wk                           # K==1: VPU broadcast path
            else:
                acc = acc + jnp.dot(slab, wk,
                                    preferred_element_type=jnp.float32)
    wide_ref[...] = jnp.maximum(acc + b_ref[...], 0.0)

    # Crop the 2 invalid trailing columns of every wide row and store TH rows.
    for r in range(TH):
        o_ref[0, r] = wide_ref[pl.ds(r * Wi, Wo), :].astype(o_ref.dtype)


def conv3x3_relu(x, w, b, *, row_tile_cap=16):
    N, H, Wi, Cin = x.shape
    Cout = w.shape[3]
    Ho, Wo = H - 2, Wi - 2
    TH = _largest_divisor_at_most(Ho, row_tile_cap)
    xf = jnp.pad(x.reshape(N, H * Wi, Cin), ((0, 0), (0, _FLAT_PAD), (0, 0)))
    Mf = xf.shape[1]
    return pl.pallas_call(
        _conv3x3_relu_kernel,
        out_shape=jax.ShapeDtypeStruct((N, Ho, Wo, Cout), x.dtype),
        grid=(N, Ho // TH),
        in_specs=[
            pl.BlockSpec((1, Mf, Cin), lambda n, t: (n, 0, 0)),      # one image per step
            pl.BlockSpec((3, 3, Cin, Cout), lambda n, t: (0, 0, 0, 0)),
            pl.BlockSpec((1, Cout), lambda n, t: (0, 0)),
        ],
        out_specs=pl.BlockSpec((1, TH, Wo, Cout), lambda n, t: (n, t, 0, 0)),
        scratch_shapes=[pltpu.VMEM((TH * Wi, Cout), jnp.float32)],
        compiler_params=pltpu.CompilerParams(
            dimension_semantics=("parallel", "parallel"),
            vmem_limit_bytes=_VMEM_LIMIT),
    )(xf, w, b)


# ----------------------------------------------------------------------------
# Conv2d(3x3) + ReLU + MaxPool2d(2,2) fused: each grid step computes 2*TP conv
# rows into a VMEM scratch and writes TP pooled rows; the conv activation never
# touches HBM.
# ----------------------------------------------------------------------------
def _conv3x3_relu_pool2x2_kernel(xf_ref, w_ref, b_ref, o_ref, wide_ref):
    # o_ref: (1, TP, Wp, Cout);  wide_ref: (2*TP*Wi, Cout) f32
    t = pl.program_id(1)
    TP, Wp, Cout = o_ref.shape[1], o_ref.shape[2], o_ref.shape[3]
    CR = 2 * TP                      # conv output rows computed per step
    L = wide_ref.shape[0]            # CR * Wi
    Wi = L // CR                     # conv input row width (= conv out width + 2)
    base = t * L

    acc = jnp.zeros((L, Cout), jnp.float32)
    for dy in range(3):
        row_base = base + dy * Wi
        for dx in range(3):
            slab = xf_ref[0, pl.ds(row_base + dx, L), :]
            acc = acc + jnp.dot(slab, w_ref[dy, dx],
                                preferred_element_type=jnp.float32)
    wide_ref[...] = jnp.maximum(acc + b_ref[...], 0.0)

    # 2x2 / stride-2 max-pool straight out of the wide conv rows.
    for p in range(TP):
        m = None
        for i in range(2):
            for j in range(2):
                start = (2 * p + i) * Wi + j
                v = wide_ref[pl.ds(start, Wp, 2), :]     # stride-2 over columns
                m = v if m is None else jnp.maximum(m, v)
        o_ref[0, p] = m.astype(o_ref.dtype)


def conv3x3_relu_maxpool2x2(x, w, b, *, pool_row_tile_cap=8):
    N, H, Wi, Cin = x.shape
    Cout = w.shape[3]
    Ho, Wo = H - 2, Wi - 2
    Hp, Wp = Ho // 2, Wo // 2
    TP = _largest_divisor_at_most(Hp, pool_row_tile_cap)
    CR = 2 * TP
    xf = jnp.pad(x.reshape(N, H * Wi, Cin), ((0, 0), (0, _FLAT_PAD), (0, 0)))
    Mf = xf.shape[1]
    return pl.pallas_call(
        _conv3x3_relu_pool2x2_kernel,
        out_shape=jax.ShapeDtypeStruct((N, Hp, Wp, Cout), x.dtype),
        grid=(N, Hp // TP),
        in_specs=[
            pl.BlockSpec((1, Mf, Cin), lambda n, t: (n, 0, 0)),
            pl.BlockSpec((3, 3, Cin, Cout), lambda n, t: (0, 0, 0, 0)),
            pl.BlockSpec((1, Cout), lambda n, t: (0, 0)),
        ],
        out_specs=pl.BlockSpec((1, TP, Wp, Cout), lambda n, t: (n, t, 0, 0)),
        scratch_shapes=[pltpu.VMEM((CR * Wi, Cout), jnp.float32)],
        compiler_params=pltpu.CompilerParams(
            dimension_semantics=("parallel", "parallel"),
            vmem_limit_bytes=_VMEM_LIMIT),
    )(xf, w, b)


# ----------------------------------------------------------------------------
# Flatten -> Linear(F,128) -> ReLU -> Linear(128,num_classes), fused, with the
# fc1 contraction streamed in K-tiles (w_fc1 is never fully VMEM-resident).
# ----------------------------------------------------------------------------
def _fc_head_kernel(x_ref, w1_ref, b1_ref, w2_ref, b2_ref, o_ref, acc_ref):
    k = pl.program_id(0)

    @pl.when(k == 0)
    def _():
        acc_ref[...] = jnp.zeros_like(acc_ref)

    acc_ref[...] += jnp.dot(x_ref[...], w1_ref[...],
                            preferred_element_type=jnp.float32)

    @pl.when(k == pl.num_programs(0) - 1)
    def _():
        h = jnp.maximum(acc_ref[...] + b1_ref[...], 0.0)
        out = jnp.dot(h, w2_ref[...], preferred_element_type=jnp.float32) + b2_ref[...]
        o_ref[...] = out.astype(o_ref.dtype)


def fc_head(x_pad, w1p, b1, w2, b2, *, tk=FC_TK):
    N, F_pad = x_pad.shape
    tk = min(tk, F_pad)
    assert F_pad % tk == 0 and tk % 128 == 0
    H1 = w1p.shape[1]
    C = w2.shape[1]
    return pl.pallas_call(
        _fc_head_kernel,
        out_shape=jax.ShapeDtypeStruct((N, C), x_pad.dtype),
        grid=(F_pad // tk,),
        in_specs=[
            pl.BlockSpec((N, tk), lambda k: (0, k)),
            pl.BlockSpec((tk, H1), lambda k: (k, 0)),     # streamed K-tiles of w_fc1
            pl.BlockSpec((1, H1), lambda k: (0, 0)),
            pl.BlockSpec((H1, C), lambda k: (0, 0)),
            pl.BlockSpec((1, C), lambda k: (0, 0)),
        ],
        out_specs=pl.BlockSpec((N, C), lambda k: (0, 0)),
        scratch_shapes=[pltpu.VMEM((N, H1), jnp.float32)],
        compiler_params=pltpu.CompilerParams(
            dimension_semantics=("arbitrary",),
            vmem_limit_bytes=_VMEM_LIMIT),
    )(x_pad, w1p, b1, w2, b2)


# ----------------------------------------------------------------------------
# Model wrapper (plain-JAX glue: layout reshapes, feature padding, param prep)
# ----------------------------------------------------------------------------
def prepare_params(params, target_hw):
    """One-time transform: fold the NCHW flatten order into w_fc1 and pad it to FC_TK."""
    Hc, Wc = target_hw[0] - 6, target_hw[1] - 6        # three valid 3x3 convs
    Hp, Wp = Hc // 2, Wc // 2                          # 2x2 max-pool
    C = params["w_conv3"].shape[3]
    F = C * Hp * Wp
    hidden = params["w_fc1"].shape[1]
    # w_fc1 rows are in PyTorch (C,H,W)-major flatten order; permute to NHWC order once.
    w1 = params["w_fc1"].reshape(C, Hp, Wp, hidden).transpose(1, 2, 0, 3).reshape(F, hidden)
    F_pad = ((F + FC_TK - 1) // FC_TK) * FC_TK
    w1 = jnp.pad(w1, ((0, F_pad - F), (0, 0)))          # zero rows: no effect on the matmul
    out = dict(params)
    out["w_fc1p"] = w1
    return out


def guitar_notes_forward(p, x_nchw):
    # x_nchw: (N, 1, H, W) like the PyTorch module
    x = jnp.transpose(x_nchw, (0, 2, 3, 1))             # NCHW -> NHWC (Cin=1: effectively free)
    x = conv3x3_relu(x, p["w_conv1"], p["b_conv1"])
    x = conv3x3_relu(x, p["w_conv2"], p["b_conv2"])
    x = conv3x3_relu_maxpool2x2(x, p["w_conv3"], p["b_conv3"])
    # nn.Dropout: identity at inference.
    N = x.shape[0]
    xf = x.reshape(N, -1)                               # NHWC flatten (w_fc1 rows pre-permuted)
    xf = jnp.pad(xf, ((0, 0), (0, p["w_fc1p"].shape[0] - xf.shape[1])))
    return fc_head(xf, p["w_fc1p"], p["b_fc1"], p["w_fc2"], p["b_fc2"])


def init_params(key, num_classes, target_hw):
    Hc = target_hw[0] - 6            # three valid 3x3 convs
    Wc = target_hw[1] - 6
    F = 64 * (Hc // 2) * (Wc // 2)   # conv_output_size from the PyTorch __init__ probe
    ks = jax.random.split(key, 10)

    def w(k, shape, fan_in):
        return jax.random.normal(k, shape, jnp.float32) / jnp.sqrt(float(fan_in))

    def b(k, n):
        return 0.01 * jax.random.normal(k, (1, n), jnp.float32)

    return {
        "w_conv1": w(ks[0], (3, 3, 1, 32), 9),
        "b_conv1": b(ks[1], 32),
        "w_conv2": w(ks[2], (3, 3, 32, 64), 9 * 32),
        "b_conv2": b(ks[3], 64),
        "w_conv3": w(ks[4], (3, 3, 64, 64), 9 * 64),
        "b_conv3": b(ks[5], 64),
        "w_fc1": w(ks[6], (F, 128), F),     # rows in PyTorch (C,H,W) flatten order
        "b_fc1": b(ks[7], 128),
        "w_fc2": w(ks[8], (128, num_classes), 128),
        "b_fc2": b(ks[9], num_classes),
    }


# Pure-JAX reference (uses the unpermuted w_fc1 with the explicit NCHW flatten).
def reference_forward(params, x_nchw):
    x = jnp.transpose(x_nchw, (0, 2, 3, 1))
    for wname, bname in (("w_conv1", "b_conv1"), ("w_conv2", "b_conv2"), ("w_conv3", "b_conv3")):
        x = lax.conv_general_dilated(
            x, params[wname], window_strides=(1, 1), padding="VALID",
            dimension_numbers=("NHWC", "HWIO", "NHWC"))
        x = jnp.maximum(x + params[bname].reshape(1, 1, 1, -1), 0.0)
    x = lax.reduce_window(x, -jnp.inf, lax.max, (1, 2, 2, 1), (1, 2, 2, 1), "VALID")
    x = jnp.transpose(x, (0, 3, 1, 2)).reshape(x.shape[0], -1)
    x = jnp.maximum(x @ params["w_fc1"] + params["b_fc1"], 0.0)
    return x @ params["w_fc2"] + params["b_fc2"]


if __name__ == "__main__":
    # Small stand-in for the original target_shape=(128, 128): 16x16 grayscale input.
    target_hw = (16, 16)
    num_classes = 10
    batch = 2

    key = jax.random.PRNGKey(0)
    kp, kx = jax.random.split(key)
    params = init_params(kp, num_classes, target_hw)
    pparams = prepare_params(params, target_hw)
    x = jax.random.normal(kx, (batch, 1, target_hw[0], target_hw[1]), jnp.float32)

    out = jax.block_until_ready(guitar_notes_forward(pparams, x))
    assert out.shape == (batch, num_classes), out.shape

    ref = jax.block_until_ready(reference_forward(params, x))
    assert jnp.allclose(out, ref, rtol=1e-3, atol=2e-3), (out, ref)

    print("KERNEL_OK")
</pallas_src>

<mosaic_0001>
module attributes {stable_mosaic.version = 11 : i64} {
  func.func @_conv3x3_relu_kernel(%arg0: i32, %arg1: i32, %arg2: memref<1x264x1xf32, #tpu.memory_space<vmem>>, %arg3: memref<3x3x1x32xf32, #tpu.memory_space<vmem>>, %arg4: memref<1x32xf32, #tpu.memory_space<vmem>>, %arg5: memref<1x14x14x32xf32, #tpu.memory_space<vmem>>, %arg6: memref<224x32xf32, #tpu.memory_space<vmem>>) attributes {dimension_semantics = [#tpu.dimension_semantics<parallel>, #tpu.dimension_semantics<parallel>], iteration_bounds = array<i64: 2, 1>, scalar_prefetch = 0 : i64, scratch_operands = 1 : i64, tpu.core_type = #tpu.core_type<tc>, window_params = [{transform_indices = @transform_0, window_bounds = array<i64: 1, 264, 1>}, {pipeline_mode = #tpu.pipeline_mode<synchronous>, transform_indices = @transform_1, window_bounds = array<i64: 3, 3, 1, 32>}, {pipeline_mode = #tpu.pipeline_mode<synchronous>, transform_indices = @transform_2, window_bounds = array<i64: 1, 32>}, {transform_indices = @transform_3, window_bounds = array<i64: 1, 14, 14, 32>}]} {
    %c224_i32 = arith.constant 224 : i32
    %0 = arith.muli %arg1, %c224_i32 : i32
    %cst = arith.constant 0.000000e+00 : f32
    %1 = vector.broadcast %cst : f32 to vector<224x32xf32>
    %c0_i32 = arith.constant 0 : i32
    %2 = arith.addi %0, %c0_i32 : i32
    %c0_i32_0 = arith.constant 0 : i32
    %3 = arith.addi %2, %c0_i32_0 : i32
    %c0 = arith.constant 0 : index
    %4 = arith.index_cast %3 : i32 to index
    %c0_1 = arith.constant 0 : index
    %5 = vector.load %arg2[%c0, %4, %c0_1] : memref<1x264x1xf32, #tpu.memory_space<vmem>>, vector<1x224x1xf32>
    %6 = vector.shape_cast %5 : vector<1x224x1xf32> to vector<224x1xf32>
    %c0_2 = arith.constant 0 : index
    %c0_3 = arith.constant 0 : index
    %c0_4 = arith.constant 0 : index
    %c0_5 = arith.constant 0 : index
    %7 = vector.load %arg3[%c0_2, %c0_3, %c0_4, %c0_5] : memref<3x3x1x32xf32, #tpu.memory_space<vmem>>, vector<1x1x1x32xf32>
    %8 = vector.shape_cast %7 : vector<1x1x1x32xf32> to vector<1x32xf32>
    %9 = vector.broadcast %6 : vector<224x1xf32> to vector<224x32xf32>
    %10 = vector.broadcast %8 : vector<1x32xf32> to vector<224x32xf32>
    %11 = arith.mulf %9, %10 : vector<224x32xf32>
    %12 = arith.addf %1, %11 : vector<224x32xf32>
    %c1_i32 = arith.constant 1 : i32
    %13 = arith.addi %2, %c1_i32 : i32
    %c0_6 = arith.constant 0 : index
    %14 = arith.index_cast %13 : i32 to index
    %c0_7 = arith.constant 0 : index
    %15 = vector.load %arg2[%c0_6, %14, %c0_7] : memref<1x264x1xf32, #tpu.memory_space<vmem>>, vector<1x224x1xf32>
    %16 = vector.shape_cast %15 : vector<1x224x1xf32> to vector<224x1xf32>
    %c0_8 = arith.constant 0 : index
    %c1 = arith.constant 1 : index
    %c0_9 = arith.constant 0 : index
    %c0_10 = arith.constant 0 : index
    %17 = vector.load %arg3[%c0_8, %c1, %c0_9, %c0_10] : memref<3x3x1x32xf32, #tpu.memory_space<vmem>>, vector<1x1x1x32xf32>
    %18 = vector.shape_cast %17 : vector<1x1x1x32xf32> to vector<1x32xf32>
    %19 = vector.broadcast %16 : vector<224x1xf32> to vector<224x32xf32>
    %20 = vector.broadcast %18 : vector<1x32xf32> to vector<224x32xf32>
    %21 = arith.mulf %19, %20 : vector<224x32xf32>
    %22 = arith.addf %12, %21 : vector<224x32xf32>
    %c2_i32 = arith.constant 2 : i32
    %23 = arith.addi %2, %c2_i32 : i32
    %c0_11 = arith.constant 0 : index
    %24 = arith.index_cast %23 : i32 to index
    %c0_12 = arith.constant 0 : index
    %25 = vector.load %arg2[%c0_11, %24, %c0_12] : memref<1x264x1xf32, #tpu.memory_space<vmem>>, vector<1x224x1xf32>
    %26 = vector.shape_cast %25 : vector<1x224x1xf32> to vector<224x1xf32>
    %c0_13 = arith.constant 0 : index
    %c2 = arith.constant 2 : index
    %c0_14 = arith.constant 0 : index
    %c0_15 = arith.constant 0 : index
    %27 = vector.load %arg3[%c0_13, %c2, %c0_14, %c0_15] : memref<3x3x1x32xf32, #tpu.memory_space<vmem>>, vector<1x1x1x32xf32>
    %28 = vector.shape_cast %27 : vector<1x1x1x32xf32> to vector<1x32xf32>
    %29 = vector.broadcast %26 : vector<224x1xf32> to vector<224x32xf32>
    %30 = vector.broadcast %28 : vector<1x32xf32> to vector<224x32xf32>
    %31 = arith.mulf %29, %30 : vector<224x32xf32>
    %32 = arith.addf %22, %31 : vector<224x32xf32>
    %c16_i32 = arith.constant 16 : i32
    %33 = arith.addi %0, %c16_i32 : i32
    %c0_i32_16 = arith.constant 0 : i32
    %34 = arith.addi %33, %c0_i32_16 : i32
    %c0_17 = arith.constant 0 : index
    %35 = arith.index_cast %34 : i32 to index
    %c0_18 = arith.constant 0 : index
    %36 = vector.load %arg2[%c0_17, %35, %c0_18] : memref<1x264x1xf32, #tpu.memory_space<vmem>>, vector<1x224x1xf32>
    %37 = vector.shape_cast %36 : vector<1x224x1xf32> to vector<224x1xf32>
    %c1_19 = arith.constant 1 : index
    %c0_20 = arith.constant 0 : index
    %c0_21 = arith.constant 0 : index
    %c0_22 = arith.constant 0 : index
    %38 = vector.load %arg3[%c1_19, %c0_20, %c0_21, %c0_22] : memref<3x3x1x32xf32, #tpu.memory_space<vmem>>, vector<1x1x1x32xf32>
    %39 = vector.shape_cast %38 : vector<1x1x1x32xf32> to vector<1x32xf32>
    %40 = vector.broadcast %37 : vector<224x1xf32> to vector<224x32xf32>
    %41 = vector.broadcast %39 : vector<1x32xf32> to vector<224x32xf32>
    %42 = arith.mulf %40, %41 : vector<224x32xf32>
    %43 = arith.addf %32, %42 : vector<224x32xf32>
    %c1_i32_23 = arith.constant 1 : i32
    %44 = arith.addi %33, %c1_i32_23 : i32
    %c0_24 = arith.constant 0 : index
    %45 = arith.index_cast %44 : i32 to index
    %c0_25 = arith.constant 0 : index
    %46 = vector.load %arg2[%c0_24, %45, %c0_25] : memref<1x264x1xf32, #tpu.memory_space<vmem>>, vector<1x224x1xf32>
    %47 = vector.shape_cast %46 : vector<1x224x1xf32> to vector<224x1xf32>
    %c1_26 = arith.constant 1 : index
    %c1_27 = arith.constant 1 : index
    %c0_28 = arith.constant 0 : index
    %c0_29 = arith.constant 0 : index
    %48 = vector.load %arg3[%c1_26, %c1_27, %c0_28, %c0_29] : memref<3x3x1x32xf32, #tpu.memory_space<vmem>>, vector<1x1x1x32xf32>
    %49 = vector.shape_cast %48 : vector<1x1x1x32xf32> to vector<1x32xf32>
    %50 = vector.broadcast %47 : vector<224x1xf32> to vector<224x32xf32>
    %51 = vector.broadcast %49 : vector<1x32xf32> to vector<224x32xf32>
    %52 = arith.mulf %50, %51 : vector<224x32xf32>
    %53 = arith.addf %43, %52 : vector<224x32xf32>
    %c2_i32_30 = arith.constant 2 : i32
    %54 = arith.addi %33, %c2_i32_30 : i32
    %c0_31 = arith.constant 0 : index
    %55 = arith.index_cast %54 : i32 to index
    %c0_32 = arith.constant 0 : index
    %56 = vector.load %arg2[%c0_31, %55, %c0_32] : memref<1x264x1xf32, #tpu.memory_space<vmem>>, vector<1x224x1xf32>
    %57 = vector.shape_cast %56 : vector<1x224x1xf32> to vector<224x1xf32>
    %c1_33 = arith.constant 1 : index
    %c2_34 = arith.constant 2 : index
    %c0_35 = arith.constant 0 : index
    %c0_36 = arith.constant 0 : index
    %58 = vector.load %arg3[%c1_33, %c2_34, %c0_35, %c0_36] : memref<3x3x1x32xf32, #tpu.memory_space<vmem>>, vector<1x1x1x32xf32>
    %59 = vector.shape_cast %58 : vector<1x1x1x32xf32> to vector<1x32xf32>
    %60 = vector.broadcast %57 : vector<224x1xf32> to vector<224x32xf32>
    %61 = vector.broadcast %59 : vector<1x32xf32> to vector<224x32xf32>
    %62 = arith.mulf %60, %61 : vector<224x32xf32>
    %63 = arith.addf %53, %62 : vector<224x32xf32>
    %c32_i32 = arith.constant 32 : i32
    %64 = arith.addi %0, %c32_i32 : i32
    %c0_i32_37 = arith.constant 0 : i32
    %65 = arith.addi %64, %c0_i32_37 : i32
    %c0_38 = arith.constant 0 : index
    %66 = arith.index_cast %65 : i32 to index
    %c0_39 = arith.constant 0 : index
    %67 = vector.load %arg2[%c0_38, %66, %c0_39] : memref<1x264x1xf32, #tpu.memory_space<vmem>>, vector<1x224x1xf32>
    %68 = vector.shape_cast %67 : vector<1x224x1xf32> to vector<224x1xf32>
    %c2_40 = arith.constant 2 : index
    %c0_41 = arith.constant 0 : index
    %c0_42 = arith.constant 0 : index
    %c0_43 = arith.constant 0 : index
    %69 = vector.load %arg3[%c2_40, %c0_41, %c0_42, %c0_43] : memref<3x3x1x32xf32, #tpu.memory_space<vmem>>, vector<1x1x1x32xf32>
    %70 = vector.shape_cast %69 : vector<1x1x1x32xf32> to vector<1x32xf32>
    %71 = vector.broadcast %68 : vector<224x1xf32> to vector<224x32xf32>
    %72 = vector.broadcast %70 : vector<1x32xf32> to vector<224x32xf32>
    %73 = arith.mulf %71, %72 : vector<224x32xf32>
    %74 = arith.addf %63, %73 : vector<224x32xf32>
    %c1_i32_44 = arith.constant 1 : i32
    %75 = arith.addi %64, %c1_i32_44 : i32
    %c0_45 = arith.constant 0 : index
    %76 = arith.index_cast %75 : i32 to index
    %c0_46 = arith.constant 0 : index
    %77 = vector.load %arg2[%c0_45, %76, %c0_46] : memref<1x264x1xf32, #tpu.memory_space<vmem>>, vector<1x224x1xf32>
    %78 = vector.shape_cast %77 : vector<1x224x1xf32> to vector<224x1xf32>
    %c2_47 = arith.constant 2 : index
    %c1_48 = arith.constant 1 : index
    %c0_49 = arith.constant 0 : index
    %c0_50 = arith.constant 0 : index
    %79 = vector.load %arg3[%c2_47, %c1_48, %c0_49, %c0_50] : memref<3x3x1x32xf32, #tpu.memory_space<vmem>>, vector<1x1x1x32xf32>
    %80 = vector.shape_cast %79 : vector<1x1x1x32xf32> to vector<1x32xf32>
    %81 = vector.broadcast %78 : vector<224x1xf32> to vector<224x32xf32>
    %82 = vector.broadcast %80 : vector<1x32xf32> to vector<224x32xf32>
    %83 = arith.mulf %81, %82 : vector<224x32xf32>
    %84 = arith.addf %74, %83 : vector<224x32xf32>
    %c2_i32_51 = arith.constant 2 : i32
    %85 = arith.addi %64, %c2_i32_51 : i32
    %c0_52 = arith.constant 0 : index
    %86 = arith.index_cast %85 : i32 to index
    %c0_53 = arith.constant 0 : index
    %87 = vector.load %arg2[%c0_52, %86, %c0_53] : memref<1x264x1xf32, #tpu.memory_space<vmem>>, vector<1x224x1xf32>
    %88 = vector.shape_cast %87 : vector<1x224x1xf32> to vector<224x1xf32>
    %c2_54 = arith.constant 2 : index
    %c2_55 = arith.constant 2 : index
    %c0_56 = arith.constant 0 : index
    %c0_57 = arith.constant 0 : index
    %89 = vector.load %arg3[%c2_54, %c2_55, %c0_56, %c0_57] : memref<3x3x1x32xf32, #tpu.memory_space<vmem>>, vector<1x1x1x32xf32>
    %90 = vector.shape_cast %89 : vector<1x1x1x32xf32> to vector<1x32xf32>
    %91 = vector.broadcast %88 : vector<224x1xf32> to vector<224x32xf32>
    %92 = vector.broadcast %90 : vector<1x32xf32> to vector<224x32xf32>
    %93 = arith.mulf %91, %92 : vector<224x32xf32>
    %94 = arith.addf %84, %93 : vector<224x32xf32>
    %c0_58 = arith.constant 0 : index
    %c0_59 = arith.constant 0 : index
    %95 = vector.load %arg4[%c0_58, %c0_59] : memref<1x32xf32, #tpu.memory_space<vmem>>, vector<1x32xf32>
    %96 = vector.broadcast %95 : vector<1x32xf32> to vector<224x32xf32>
    %97 = arith.addf %94, %96 : vector<224x32xf32>
    %cst_60 = arith.constant 0.000000e+00 : f32
    %98 = vector.broadcast %cst_60 : f32 to vector<224x32xf32>
    %99 = arith.maximumf %97, %98 : vector<224x32xf32>
    %c0_61 = arith.constant 0 : index
    %c0_62 = arith.constant 0 : index
    %100 = vector.load %arg6[%c0_61, %c0_62] : memref<224x32xf32, #tpu.memory_space<vmem>>, vector<224x32xf32>
    tpu.vector_store %arg6[%c0_61, %c0_62], %99 {strides = array<i32>} : memref<224x32xf32, #tpu.memory_space<vmem>>, vector<224x32xf32>,
    %c0_63 = arith.constant 0 : index
    %c0_64 = arith.constant 0 : index
    %101 = vector.load %arg6[%c0_63, %c0_64] : memref<224x32xf32, #tpu.memory_space<vmem>>, vector<14x32xf32>
    %c0_65 = arith.constant 0 : index
    %c0_66 = arith.constant 0 : index
    %c0_67 = arith.constant 0 : index
    %c0_68 = arith.constant 0 : index
    %102 = vector.load %arg5[%c0_65, %c0_66, %c0_67, %c0_68] : memref<1x14x14x32xf32, #tpu.memory_space<vmem>>, vector<1x1x14x32xf32>
    %103 = vector.shape_cast %102 : vector<1x1x14x32xf32> to vector<14x32xf32>
    %104 = vector.shape_cast %101 : vector<14x32xf32> to vector<1x1x14x32xf32>
    tpu.vector_store %arg5[%c0_65, %c0_66, %c0_67, %c0_68], %104 {strides = array<i32>} : memref<1x14x14x32xf32, #tpu.memory_space<vmem>>, vector<1x1x14x32xf32>,
    %c16 = arith.constant 16 : index
    %c0_69 = arith.constant 0 : index
    %105 = vector.load %arg6[%c16, %c0_69] : memref<224x32xf32, #tpu.memory_space<vmem>>, vector<14x32xf32>
    %c0_70 = arith.constant 0 : index
    %c1_71 = arith.constant 1 : index
    %c0_72 = arith.constant 0 : index
    %c0_73 = arith.constant 0 : index
    %106 = vector.load %arg5[%c0_70, %c1_71, %c0_72, %c0_73] : memref<1x14x14x32xf32, #tpu.memory_space<vmem>>, vector<1x1x14x32xf32>
    %107 = vector.shape_cast %106 : vector<1x1x14x32xf32> to vector<14x32xf32>
    %108 = vector.shape_cast %105 : vector<14x32xf32> to vector<1x1x14x32xf32>
    tpu.vector_store %arg5[%c0_70, %c1_71, %c0_72, %c0_73], %108 {strides = array<i32>} : memref<1x14x14x32xf32, #tpu.memory_space<vmem>>, vector<1x1x14x32xf32>,
    %c32 = arith.constant 32 : index
    %c0_74 = arith.constant 0 : index
    %109 = vector.load %arg6[%c32, %c0_74] : memref<224x32xf32, #tpu.memory_space<vmem>>, vector<14x32xf32>
    %c0_75 = arith.constant 0 : index
    %c2_76 = arith.constant 2 : index
    %c0_77 = arith.constant 0 : index
    %c0_78 = arith.constant 0 : index
    %110 = vector.load %arg5[%c0_75, %c2_76, %c0_77, %c0_78] : memref<1x14x14x32xf32, #tpu.memory_space<vmem>>, vector<1x1x14x32xf32>
    %111 = vector.shape_cast %110 : vector<1x1x14x32xf32> to vector<14x32xf32>
    %112 = vector.shape_cast %109 : vector<14x32xf32> to vector<1x1x14x32xf32>
    tpu.vector_store %arg5[%c0_75, %c2_76, %c0_77, %c0_78], %112 {strides = array<i32>} : memref<1x14x14x32xf32, #tpu.memory_space<vmem>>, vector<1x1x14x32xf32>,
    %c48 = arith.constant 48 : index
    %c0_79 = arith.constant 0 : index
    %113 = vector.load %arg6[%c48, %c0_79] : memref<224x32xf32, #tpu.memory_space<vmem>>, vector<14x32xf32>
    %c0_80 = arith.constant 0 : index
    %c3 = arith.constant 3 : index
    %c0_81 = arith.constant 0 : index
    %c0_82 = arith.constant 0 : index
    %114 = vector.load %arg5[%c0_80, %c3, %c0_81, %c0_82] : memref<1x14x14x32xf32, #tpu.memory_space<vmem>>, vector<1x1x14x32xf32>
    %115 = vector.shape_cast %114 : vector<1x1x14x32xf32> to vector<14x32xf32>
    %116 = vector.shape_cast %113 : vector<14x32xf32> to vector<1x1x14x32xf32>
    tpu.vector_store %arg5[%c0_80, %c3, %c0_81, %c0_82], %116 {strides = array<i32>} : memref<1x14x14x32xf32, #tpu.memory_space<vmem>>, vector<1x1x14x32xf32>,
    %c64 = arith.constant 64 : index
    %c0_83 = arith.constant 0 : index
    %117 = vector.load %arg6[%c64, %c0_83] : memref<224x32xf32, #tpu.memory_space<vmem>>, vector<14x32xf32>
    %c0_84 = arith.constant 0 : index
    %c4 = arith.constant 4 : index
    %c0_85 = arith.constant 0 : index
    %c0_86 = arith.constant 0 : index
    %118 = vector.load %arg5[%c0_84, %c4, %c0_85, %c0_86] : memref<1x14x14x32xf32, #tpu.memory_space<vmem>>, vector<1x1x14x32xf32>
    %119 = vector.shape_cast %118 : vector<1x1x14x32xf32> to vector<14x32xf32>
    %120 = vector.shape_cast %117 : vector<14x32xf32> to vector<1x1x14x32xf32>
    tpu.vector_store %arg5[%c0_84, %c4, %c0_85, %c0_86], %120 {strides = array<i32>} : memref<1x14x14x32xf32, #tpu.memory_space<vmem>>, vector<1x1x14x32xf32>,
    %c80 = arith.constant 80 : index
    %c0_87 = arith.constant 0 : index
    %121 = vector.load %arg6[%c80, %c0_87] : memref<224x32xf32, #tpu.memory_space<vmem>>, vector<14x32xf32>
    %c0_88 = arith.constant 0 : index
    %c5 = arith.constant 5 : index
    %c0_89 = arith.constant 0 : index
    %c0_90 = arith.constant 0 : index
    %122 = vector.load %arg5[%c0_88, %c5, %c0_89, %c0_90] : memref<1x14x14x32xf32, #tpu.memory_space<vmem>>, vector<1x1x14x32xf32>
    %123 = vector.shape_cast %122 : vector<1x1x14x32xf32> to vector<14x32xf32>
    %124 = vector.shape_cast %121 : vector<14x32xf32> to vector<1x1x14x32xf32>
    tpu.vector_store %arg5[%c0_88, %c5, %c0_89, %c0_90], %124 {strides = array<i32>} : memref<1x14x14x32xf32, #tpu.memory_space<vmem>>, vector<1x1x14x32xf32>,
    %c96 = arith.constant 96 : index
    %c0_91 = arith.constant 0 : index
    %125 = vector.load %arg6[%c96, %c0_91] : memref<224x32xf32, #tpu.memory_space<vmem>>, vector<14x32xf32>
    %c0_92 = arith.constant 0 : index
    %c6 = arith.constant 6 : index
    %c0_93 = arith.constant 0 : index
    %c0_94 = arith.constant 0 : index
    %126 = vector.load %arg5[%c0_92, %c6, %c0_93, %c0_94] : memref<1x14x14x32xf32, #tpu.memory_space<vmem>>, vector<1x1x14x32xf32>
    %127 = vector.shape_cast %126 : vector<1x1x14x32xf32> to vector<14x32xf32>
    %128 = vector.shape_cast %125 : vector<14x32xf32> to vector<1x1x14x32xf32>
    tpu.vector_store %arg5[%c0_92, %c6, %c0_93, %c0_94], %128 {strides = array<i32>} : memref<1x14x14x32xf32, #tpu.memory_space<vmem>>, vector<1x1x14x32xf32>,
    %c112 = arith.constant 112 : index
    %c0_95 = arith.constant 0 : index
    %129 = vector.load %arg6[%c112, %c0_95] : memref<224x32xf32, #tpu.memory_space<vmem>>, vector<14x32xf32>
    %c0_96 = arith.constant 0 : index
    %c7 = arith.constant 7 : index
    %c0_97 = arith.constant 0 : index
    %c0_98 = arith.constant 0 : index
    %130 = vector.load %arg5[%c0_96, %c7, %c0_97, %c0_98] : memref<1x14x14x32xf32, #tpu.memory_space<vmem>>, vector<1x1x14x32xf32>
    %131 = vector.shape_cast %130 : vector<1x1x14x32xf32> to vector<14x32xf32>
    %132 = vector.shape_cast %129 : vector<14x32xf32> to vector<1x1x14x32xf32>
    tpu.vector_store %arg5[%c0_96, %c7, %c0_97, %c0_98], %132 {strides = array<i32>} : memref<1x14x14x32xf32, #tpu.memory_space<vmem>>, vector<1x1x14x32xf32>,
    %c128 = arith.constant 128 : index
    %c0_99 = arith.constant 0 : index
    %133 = vector.load %arg6[%c128, %c0_99] : memref<224x32xf32, #tpu.memory_space<vmem>>, vector<14x32xf32>
    %c0_100 = arith.constant 0 : index
    %c8 = arith.constant 8 : index
    %c0_101 = arith.constant 0 : index
    %c0_102 = arith.constant 0 : index
    %134 = vector.load %arg5[%c0_100, %c8, %c0_101, %c0_102] : memref<1x14x14x32xf32, #tpu.memory_space<vmem>>, vector<1x1x14x32xf32>
    %135 = vector.shape_cast %134 : vector<1x1x14x32xf32> to vector<14x32xf32>
    %136 = vector.shape_cast %133 : vector<14x32xf32> to vector<1x1x14x32xf32>
    tpu.vector_store %arg5[%c0_100, %c8, %c0_101, %c0_102], %136 {strides = array<i32>} : memref<1x14x14x32xf32, #tpu.memory_space<vmem>>, vector<1x1x14x32xf32>,
    %c144 = arith.constant 144 : index
    %c0_103 = arith.constant 0 : index
    %137 = vector.load %arg6[%c144, %c0_103] : memref<224x32xf32, #tpu.memory_space<vmem>>, vector<14x32xf32>
    %c0_104 = arith.constant 0 : index
    %c9 = arith.constant 9 : index
    %c0_105 = arith.constant 0 : index
    %c0_106 = arith.constant 0 : index
    %138 = vector.load %arg5[%c0_104, %c9, %c0_105, %c0_106] : memref<1x14x14x32xf32, #tpu.memory_space<vmem>>, vector<1x1x14x32xf32>
    %139 = vector.shape_cast %138 : vector<1x1x14x32xf32> to vector<14x32xf32>
    %140 = vector.shape_cast %137 : vector<14x32xf32> to vector<1x1x14x32xf32>
    tpu.vector_store %arg5[%c0_104, %c9, %c0_105, %c0_106], %140 {strides = array<i32>} : memref<1x14x14x32xf32, #tpu.memory_space<vmem>>, vector<1x1x14x32xf32>,
    %c160 = arith.constant 160 : index
    %c0_107 = arith.constant 0 : index
    %141 = vector.load %arg6[%c160, %c0_107] : memref<224x32xf32, #tpu.memory_space<vmem>>, vector<14x32xf32>
    %c0_108 = arith.constant 0 : index
    %c10 = arith.constant 10 : index
    %c0_109 = arith.constant 0 : index
    %c0_110 = arith.constant 0 : index
    %142 = vector.load %arg5[%c0_108, %c10, %c0_109, %c0_110] : memref<1x14x14x32xf32, #tpu.memory_space<vmem>>, vector<1x1x14x32xf32>
    %143 = vector.shape_cast %142 : vector<1x1x14x32xf32> to vector<14x32xf32>
    %144 = vector.shape_cast %141 : vector<14x32xf32> to vector<1x1x14x32xf32>
    tpu.vector_store %arg5[%c0_108, %c10, %c0_109, %c0_110], %144 {strides = array<i32>} : memref<1x14x14x32xf32, #tpu.memory_space<vmem>>, vector<1x1x14x32xf32>,
    %c176 = arith.constant 176 : index
    %c0_111 = arith.constant 0 : index
    %145 = vector.load %arg6[%c176, %c0_111] : memref<224x32xf32, #tpu.memory_space<vmem>>, vector<14x32xf32>
    %c0_112 = arith.constant 0 : index
    %c11 = arith.constant 11 : index
    %c0_113 = arith.constant 0 : index
    %c0_114 = arith.constant 0 : index
    %146 = vector.load %arg5[%c0_112, %c11, %c0_113, %c0_114] : memref<1x14x14x32xf32, #tpu.memory_space<vmem>>, vector<1x1x14x32xf32>
    %147 = vector.shape_cast %146 : vector<1x1x14x32xf32> to vector<14x32xf32>
    %148 = vector.shape_cast %145 : vector<14x32xf32> to vector<1x1x14x32xf32>
    tpu.vector_store %arg5[%c0_112, %c11, %c0_113, %c0_114], %148 {strides = array<i32>} : memref<1x14x14x32xf32, #tpu.memory_space<vmem>>, vector<1x1x14x32xf32>,
    %c192 = arith.constant 192 : index
    %c0_115 = arith.constant 0 : index
    %149 = vector.load %arg6[%c192, %c0_115] : memref<224x32xf32, #tpu.memory_space<vmem>>, vector<14x32xf32>
    %c0_116 = arith.constant 0 : index
    %c12 = arith.constant 12 : index
    %c0_117 = arith.constant 0 : index
    %c0_118 = arith.constant 0 : index
    %150 = vector.load %arg5[%c0_116, %c12, %c0_117, %c0_118] : memref<1x14x14x32xf32, #tpu.memory_space<vmem>>, vector<1x1x14x32xf32>
    %151 = vector.shape_cast %150 : vector<1x1x14x32xf32> to vector<14x32xf32>
    %152 = vector.shape_cast %149 : vector<14x32xf32> to vector<1x1x14x32xf32>
    tpu.vector_store %arg5[%c0_116, %c12, %c0_117, %c0_118], %152 {strides = array<i32>} : memref<1x14x14x32xf32, #tpu.memory_space<vmem>>, vector<1x1x14x32xf32>,
    %c208 = arith.constant 208 : index
    %c0_119 = arith.constant 0 : index
    %153 = vector.load %arg6[%c208, %c0_119] : memref<224x32xf32, #tpu.memory_space<vmem>>, vector<14x32xf32>
    %c0_120 = arith.constant 0 : index
    %c13 = arith.constant 13 : index
    %c0_121 = arith.constant 0 : index
    %c0_122 = arith.constant 0 : index
    %154 = vector.load %arg5[%c0_120, %c13, %c0_121, %c0_122] : memref<1x14x14x32xf32, #tpu.memory_space<vmem>>, vector<1x1x14x32xf32>
    %155 = vector.shape_cast %154 : vector<1x1x14x32xf32> to vector<14x32xf32>
    %156 = vector.shape_cast %153 : vector<14x32xf32> to vector<1x1x14x32xf32>
    tpu.vector_store %arg5[%c0_120, %c13, %c0_121, %c0_122], %156 {strides = array<i32>} : memref<1x14x14x32xf32, #tpu.memory_space<vmem>>, vector<1x1x14x32xf32>,
    return
  }
  func.func @transform_0(%arg0: i32, %arg1: i32) -> (i32, i32, i32) {
    %c0_i32 = arith.constant 0 : i32
    %c0_i32_0 = arith.constant 0 : i32
    %c0_i32_1 = arith.constant 0 : i32
    return %arg0, %c0_i32, %c0_i32_0 : i32, i32, i32
  }
  func.func @transform_1(%arg0: i32, %arg1: i32) -> (i32, i32, i32, i32) {
    %c0_i32 = arith.constant 0 : i32
    %c0_i32_0 = arith.constant 0 : i32
    %c0_i32_1 = arith.constant 0 : i32
    %c0_i32_2 = arith.constant 0 : i32
    %c0_i32_3 = arith.constant 0 : i32
    return %c0_i32, %c0_i32_0, %c0_i32_1, %c0_i32_2 : i32, i32, i32, i32
  }
  func.func @transform_2(%arg0: i32, %arg1: i32) -> (i32, i32) {
    %c0_i32 = arith.constant 0 : i32
    %c0_i32_0 = arith.constant 0 : i32
    %c0_i32_1 = arith.constant 0 : i32
    return %c0_i32, %c0_i32_0 : i32, i32
  }
  func.func @transform_3(%arg0: i32, %arg1: i32) -> (i32, i32, i32, i32) {
    %c0_i32 = arith.constant 0 : i32
    %c0_i32_0 = arith.constant 0 : i32
    %c0_i32_1 = arith.constant 0 : i32
    return %arg0, %arg1, %c0_i32, %c0_i32_0 : i32, i32, i32, i32
  }
}

</mosaic_0001>

<bundles_post_ra>
// kernel: tpu_custom_call.1
= control target key start
LH: loop header
LB: loop body
LE: loop exit
PB: predicated region body
PF: predicated region fallthrough
CT: control target
= control target key end

     0   :  { %s2902_s12 = smov 0   ;;  %s2904_s13 = smov 0   ;;  %s4530_s0 = inlined_call_operand.vmem [shape: f32[2,264,1], index: 0, kind: input, shape index: {}]   ;;  %s4531_s1 = inlined_call_operand.vmem [shape: f32[3,3,1,32], index: 1, kind: input, shape index: {}]   ;;  %s4532_s2 = inlined_call_operand.vmem [shape: f32[1,32], index: 2, kind: input, shape index: {}]   ;;  %s4533_s3 = inlined_call_operand.vmem [shape: f32[2,14,14,32], index: 3, kind: output, shape index: {}]  }
   0x1   :  { %s2906_s14 = smov 0  }
   0x2 LB: > { %s25_s15 = sadd.s32 1, %s2875_s13  ;;  %p2550_p0 = scmp.ge.s32.totalorder %s2879_s14, 1  ;;  %s2879_s14 = sphi %s2906_s14, %s13_s14   ;;  %s2875_s13 = sphi %s2904_s13, %s4773_s13   ;;  %s2871_s12 = sphi %s2902_s12, %s4772_s12  }
   0x3   : > { %p27_p1 = scmp.ge.s32.totalorder %s25_s15, 2  ;;  %p151_p2 = scmp.lt.s32.totalorder %s2879_s14, 3 }
   0x5   : > { %s4775_s15 = smov (%p27_p1, %s25_s15), 0  ;;  %p152_p3 = pnand %p2550_p0, %p151_p2 }
   0x7   : > { %155 = sbr.rel (%p152_p3) target bundleno = 817 (0x331), region = 32 }
   0xc   : > { %p180_p4 = scmp.lt.s32.totalorder %s2871_s12, 1  ;;  %v2881_v0 = vmov 0   ;;  %vm2334_vm0 = vcmask 261120   ;;  %vm2366_vm1 = vcmask 259072  }
   0xd   : > { %2842 = vset.pattern.permute.xlu2 %v2881_v0  ;;  %2841 = vset.pattern.permute.xlu1 %v2881_v0 }
   0xe   : > { %2840 = vset.pattern.permute.xlu0 %v2881_v0  ;;  %s4777_s12 = smov (!%p180_p4, %s2871_s12), 1 }
   0xf   : > { %s2813_s16 = smul.u32 264, %s4777_s12 }
  0x10   : > { %s2814_s17 = smul.u32 224, %s4777_s12 }
  0x11   : > { %s2926_s19 = scalar_lea.vmem %s4530_s0, %s2813_s16 }
  0x12   : > { %v2929_v1 = vld [vmem:[%s2926_s19 + $0x20] sm:$0xff]  ;;  %v2932_v2 = vld [vmem:[%s2926_s19 + $0x10] sm:$0xff]  ;;  %v2938_v4 = vld [vmem:[%s2926_s19 + $0x28] sm:$0xff]  ;;  %s4332_s20 = scalar_lea.vmem %s4533_s3, %s2814_s17 }
  0x13   : > { %v198_v3 = vld [vmem:[%s2926_s19] sm:$0xff]  ;;  %249 = vperm.xlu2 %2842, %v2929_v1   ;;  %239 = vperm.xlu1 %2841, %v2932_v2   ;;  %v2941_v5 = vld [vmem:[%s2926_s19 + $0x18] sm:$0xff]  ;;  %v199_v6 = vld [vmem:[%s2926_s19 + $0x8] sm:$0xff] }
  0x14   : > { %229 = vperm.xlu0 %2840, %v198_v3   ;;  %v2947_v7 = vld [vmem:[%s2926_s19 + $0x40] sm:$0xff]  ;;  %v2950_v8 = vld [vmem:[%s2926_s19 + $0x38] sm:$0xff]  ;;  %v2953_v9 = vld [vmem:[%s2926_s19 + $0x30] sm:$0xff] }
  0x15   : > { %v2959_v10 = vld [vmem:[%s2926_s19 + $0x58] sm:$0xff]  ;;  %v2962_v11 = vld [vmem:[%s2926_s19 + $0x50] sm:$0xff]  ;;  %v2965_v12 = vld [vmem:[%s2926_s19 + $0x48] sm:$0xff] }
  0x16   : > { %v2971_v13 = vld [vmem:[%s2926_s19 + $0x70] sm:$0xff]  ;;  %v2974_v14 = vld [vmem:[%s2926_s19 + $0x68] sm:$0xff]  ;;  %v2977_v15 = vld [vmem:[%s2926_s19 + $0x60] sm:$0xff] }
  0x17   : > { %v2983_v16 = vld [vmem:[%s2926_s19 + $0x88] sm:$0xff]  ;;  %v2986_v17 = vld [vmem:[%s2926_s19 + $0x80] sm:$0xff]  ;;  %v2989_v18 = vld [vmem:[%s2926_s19 + $0x78] sm:$0xff] }
  0x18   : > { %v2995_v19 = vld [vmem:[%s2926_s19 + $0xa0] sm:$0xff]  ;;  %v2998_v20 = vld [vmem:[%s2926_s19 + $0x98] sm:$0xff]  ;;  %v3001_v21 = vld [vmem:[%s2926_s19 + $0x90] sm:$0xff] }
  0x19   : > { %v3007_v22 = vld [vmem:[%s2926_s19 + $0xb8] sm:$0xff]  ;;  %v3010_v23 = vld [vmem:[%s2926_s19 + $0xb0] sm:$0xff]  ;;  %v3013_v24 = vld [vmem:[%s2926_s19 + $0xa8] sm:$0xff] }
  0x1a   : > { %v3019_v25 = vld [vmem:[%s2926_s19 + $0xd0] sm:$0xff]  ;;  %v3022_v26 = vld [vmem:[%s2926_s19 + $0xc8] sm:$0xff]  ;;  %v3025_v27 = vld [vmem:[%s2926_s19 + $0xc0] sm:$0xff] }
  0x1b   : > { %254 = vperm.xlu2 %2842, %v2938_v4   ;;  %244 = vperm.xlu1 %2841, %v2941_v5   ;;  %v2554_v28 = vld [vmem:[%s2926_s19 + $0x9] sm:$0xff]  ;;  %v2553_v29 = vld [vmem:[%s2926_s19 + $0x1] sm:$0xff]  ;;  %v3033_v30 = vld [vmem:[%s2926_s19 + $0xd8] sm:$0xff] }
  0x1c   : > { %234 = vperm.xlu0 %2840, %v199_v6   ;;  %v3037_v31 = vld [vmem:[%s2926_s19 + $0x21] sm:$0xff]  ;;  %v3040_v32 = vld [vmem:[%s2926_s19 + $0x19] sm:$0xff]  ;;  %v3043_v33 = vld [vmem:[%s2926_s19 + $0x11] sm:$0xff] }
  0x1d   : > { %v3049_v34 = vld [vmem:[%s2926_s19 + $0x39] sm:$0xff]  ;;  %v3052_v35 = vld [vmem:[%s2926_s19 + $0x31] sm:$0xff]  ;;  %v3055_v36 = vld [vmem:[%s2926_s19 + $0x29] sm:$0xff] }
  0x1e   : > { %v3063_v38 = vld [vmem:[%s2926_s19 + $0x51] sm:$0xff]  ;;  %v3066_v39 = vld [vmem:[%s2926_s19 + $0x49] sm:$0xff]  ;;  %v3069_v40 = vld [vmem:[%s2926_s19 + $0x41] sm:$0xff] }
  0x1f   : > { %v3077_v42 = vld [vmem:[%s2926_s19 + $0x69] sm:$0xff]  ;;  %v3080_v43 = vld [vmem:[%s2926_s19 + $0x61] sm:$0xff]  ;;  %v3083_v44 = vld [vmem:[%s2926_s19 + $0x59] sm:$0xff] }
  0x20   : > { %v3091_v46 = vld [vmem:[%s2926_s19 + $0x81] sm:$0xff]  ;;  %v3094_v47 = vld [vmem:[%s2926_s19 + $0x79] sm:$0xff]  ;;  %v3097_v48 = vld [vmem:[%s2926_s19 + $0x71] sm:$0xff] }
  0x21   : > { %v3109_v52 = vld [vmem:[%s2926_s19 + $0x99] sm:$0xff]  ;;  %v3112_v53 = vld [vmem:[%s2926_s19 + $0x91] sm:$0xff]  ;;  %v3115_v54 = vld [vmem:[%s2926_s19 + $0x89] sm:$0xff] }
  0x22   : > { %v3127_v58 = vld [vmem:[%s2926_s19 + $0xb1] sm:$0xff]  ;;  %v3130_v59 = vld [vmem:[%s2926_s19 + $0xa9] sm:$0xff]  ;;  %v3133_v60 = vld [vmem:[%s2926_s19 + $0xa1] sm:$0xff] }
  0x23   : > { %269 = vperm.xlu2 %2842, %v2947_v7   ;;  %264 = vperm.xlu1 %2841, %v2950_v8   ;;  %v3145_v0 = vld [vmem:[%s2926_s19 + $0xc9] sm:$0xff]  ;;  %v3148_v3 = vld [vmem:[%s2926_s19 + $0xc1] sm:$0xff]  ;;  %v3151_v6 = vld [vmem:[%s2926_s19 + $0xb9] sm:$0xff] }
  0x24   : > { %259 = vperm.xlu0 %2840, %v2953_v9  }
  0x2b   : > { %284 = vperm.xlu2 %2842, %v2959_v10   ;;  %279 = vperm.xlu1 %2841, %v2962_v11  }
  0x2c   : > { %274 = vperm.xlu0 %2840, %v2965_v12  }
  0x33   : > { %299 = vperm.xlu2 %2842, %v2971_v13   ;;  %294 = vperm.xlu1 %2841, %v2974_v14  }
  0x34   : > { %289 = vperm.xlu0 %2840, %v2977_v15  }
  0x3b   : > { %314 = vperm.xlu2 %2842, %v2983_v16   ;;  %309 = vperm.xlu1 %2841, %v2986_v17  }
  0x3c   : > { %304 = vperm.xlu0 %2840, %v2989_v18  }
  0x43   : > { %329 = vperm.xlu2 %2842, %v2995_v19   ;;  %324 = vperm.xlu1 %2841, %v2998_v20  }
  0x44   : > { %319 = vperm.xlu0 %2840, %v3001_v21  }
  0x4b   : > { %344 = vperm.xlu2 %2842, %v3007_v22   ;;  %339 = vperm.xlu1 %2841, %v3010_v23  }
  0x4c   : > { %334 = vperm.xlu0 %2840, %v3013_v24  }
  0x53   : > { %359 = vperm.xlu2 %2842, %v3019_v25   ;;  %354 = vperm.xlu1 %2841, %v3022_v26  }
  0x54   : > { %349 = vperm.xlu0 %2840, %v3025_v27  }
  0x5b   : > { %465 = vperm.xlu2 %2842, %v2554_v28   ;;  %460 = vperm.xlu1 %2841, %v2553_v29  }
  0x5c   : > { %364 = vperm.xlu0 %2840, %v3033_v30  }
  0x63   : > { %480 = vperm.xlu2 %2842, %v3037_v31   ;;  %475 = vperm.xlu1 %2841, %v3040_v32  }
  0x64   : > { %470 = vperm.xlu0 %2840, %v3043_v33  }
  0x6b   : > { %495 = vperm.xlu2 %2842, %v3049_v34   ;;  %490 = vperm.xlu1 %2841, %v3052_v35  }
  0x6c   : > { %485 = vperm.xlu0 %2840, %v3055_v36  }
  0x6d   : > { %v3060_v37 = vpop.permute.xlu2 %249 }
  0x6e   : > { %4556 = vst [vmem:[#allocation3_spill] sm:$0xff] %v3060_v37  ;;  %v3214_v37 = vld [vmem:[%s2926_s19 + $0x42] sm:$0xff] }
  0x6f   : > { %4583 = vst [vmem:[#allocation30_spill] sm:$0xff] %v3214_v37 }
  0x73   : > { %510 = vperm.xlu2 %2842, %v3063_v38   ;;  %505 = vperm.xlu1 %2841, %v3066_v39  }
  0x74   : > { %500 = vperm.xlu0 %2840, %v3069_v40  }
  0x75   : > { %v3074_v41 = vpop.permute.xlu2 %254 }
  0x76   : > { %4557 = vst [vmem:[#allocation4_spill] sm:$0xff] %v3074_v41  ;;  %v3199_v41 = vld [vmem:[%s2926_s19 + $0x22] sm:$0xff] }
  0x7b   : > { %525 = vperm.xlu2 %2842, %v3077_v42   ;;  %520 = vperm.xlu1 %2841, %v3080_v43  }
  0x7c   : > { %515 = vperm.xlu0 %2840, %v3083_v44  }
  0x7d   : > { %v3088_v45 = vpop.permute.xlu2 %269 }
  0x7e   : > { %4558 = vst [vmem:[#allocation5_spill] sm:$0xff] %v3088_v45  ;;  %v2583_v45 = vld [vmem:[%s2926_s19 + $0xa] sm:$0xff] }
  0x83   : > { %540 = vperm.xlu2 %2842, %v3091_v46   ;;  %535 = vperm.xlu1 %2841, %v3094_v47  }
  0x84   : > { %530 = vperm.xlu0 %2840, %v3097_v48  }
  0x85   : > { %v3102_v49 = vpop.permute.xlu2 %284  ;;  %v3104_v50 = vpop.permute.xlu1 %239 }
  0x86   : > { %4559 = vst [vmem:[#allocation6_spill] sm:$0xff] %v3102_v49  ;;  %v3106_v51 = vpop.permute.xlu0 %229  ;;  %v3164_v49 = vld [vmem:[%s2926_s19 + $0xd9] sm:$0xff] }
  0x87   : > { %4560 = vst [vmem:[#allocation7_spill] sm:$0xff] %v3104_v50  ;;  %v3181_v50 = vld [vmem:[%s2926_s19 + $0x12] sm:$0xff] }
  0x88   : > { %4561 = vst [vmem:[#allocation8_spill] sm:$0xff] %v3106_v51  ;;  %v3229_v51 = vld [vmem:[%s2926_s19 + $0x62] sm:$0xff] }
  0x89   : > { %4588 = vst [vmem:[#allocation35_spill] sm:$0xff] %v3229_v51 }
  0x8b   : > { %555 = vperm.xlu2 %2842, %v3109_v52   ;;  %550 = vperm.xlu1 %2841, %v3112_v53  }
  0x8c   : > { %545 = vperm.xlu0 %2840, %v3115_v54  }
  0x8d   : > { %v3120_v55 = vpop.permute.xlu2 %299  ;;  %v3122_v56 = vpop.permute.xlu1 %244 }
  0x8e   : > { %4562 = vst [vmem:[#allocation9_spill] sm:$0xff] %v3120_v55  ;;  %v3124_v57 = vpop.permute.xlu0 %234  ;;  %v2582_v55 = vld [vmem:[%s2926_s19 + $0x2] sm:$0xff] }
  0x8f   : > { %4563 = vst [vmem:[#allocation10_spill] sm:$0xff] %v3122_v56  ;;  %v3217_v56 = vld [vmem:[%s2926_s19 + $0x3a] sm:$0xff] }
  0x90   : > { %4564 = vst [vmem:[#allocation11_spill] sm:$0xff] %v3124_v57 }
  0x91   : > { %4584 = vst [vmem:[#allocation31_spill] sm:$0xff] %v3217_v56 }
  0x93   : > { %570 = vperm.xlu2 %2842, %v3127_v58   ;;  %565 = vperm.xlu1 %2841, %v3130_v59  }
  0x94   : > { %560 = vperm.xlu0 %2840, %v3133_v60  }
  0x95   : > { %v3138_v61 = vpop.permute.xlu2 %314  ;;  %v3140_v62 = vpop.permute.xlu1 %264 }
  0x96   : > { %4565 = vst [vmem:[#allocation12_spill] sm:$0xff] %v3138_v61  ;;  %v3142_v63 = vpop.permute.xlu0 %259 }
  0x97   : > { %4566 = vst [vmem:[#allocation13_spill] sm:$0xff] %v3140_v62  ;;  %v3167_v62 = vld [vmem:[%s2926_s19 + $0xd1] sm:$0xff] }
  0x98   : > { %4567 = vst [vmem:[#allocation14_spill] sm:$0xff] %v3142_v63  ;;  %v3196_v63 = vld [vmem:[%s2926_s19 + $0x2a] sm:$0xff] }
  0x9b   : > { %585 = vperm.xlu2 %2842, %v3145_v0   ;;  %580 = vperm.xlu1 %2841, %v3148_v3  }
  0x9c   : > { %575 = vperm.xlu0 %2840, %v3151_v6  }
  0x9d   : > { %v3156_v28 = vpop.permute.xlu2 %329  ;;  %v3158_v29 = vpop.permute.xlu1 %279 }
  0x9e   : > { %4568 = vst [vmem:[#allocation15_spill] sm:$0xff] %v3156_v28  ;;  %v3160_v61 = vpop.permute.xlu0 %274 }
  0x9f   : > { %4569 = vst [vmem:[#allocation16_spill] sm:$0xff] %v3158_v29 }
  0xa0   : > { %4570 = vst [vmem:[#allocation17_spill] sm:$0xff] %v3160_v61  ;;  %v3178_v61 = vld [vmem:[%s2926_s19 + $0x1a] sm:$0xff] }
  0xa1   : > { %4574 = vst [vmem:[#allocation21_spill] sm:$0xff] %v3178_v61 }
  0xa3   : > { %691 = vperm.xlu2 %2842, %v2582_v55   ;;  %595 = vperm.xlu1 %2841, %v3164_v49  }
  0xa4   : > { %590 = vperm.xlu0 %2840, %v3167_v62  }
  0xa5   : > { %v3171_v57 = vpop.permute.xlu2 %344  ;;  %v3173_v28 = vpop.permute.xlu1 %294 }
  0xa6   : > { %4571 = vst [vmem:[#allocation18_spill] sm:$0xff] %v3171_v57  ;;  %v3175_v29 = vpop.permute.xlu0 %289 }
  0xa7   : > { %4572 = vst [vmem:[#allocation19_spill] sm:$0xff] %v3173_v28 }
  0xa8   : > { %4573 = vst [vmem:[#allocation20_spill] sm:$0xff] %v3175_v29  ;;  %v3193_v29 = vld [vmem:[%s2926_s19 + $0x32] sm:$0xff] }
  0xa9   : > { %4578 = vst [vmem:[#allocation25_spill] sm:$0xff] %v3193_v29 }
  0xab   : > { %706 = vperm.xlu2 %2842, %v3178_v61   ;;  %701 = vperm.xlu1 %2841, %v3181_v50   ;;  %v3235_v61 = vld [vmem:[%s2926_s19 + $0x52] sm:$0xff] }
  0xac   : > { %696 = vperm.xlu0 %2840, %v2583_v45   ;;  %4590 = vst [vmem:[#allocation37_spill] sm:$0xff] %v3235_v61 }
  0xad   : > { %v3186_v55 = vpop.permute.xlu2 %359  ;;  %v3188_v57 = vpop.permute.xlu1 %309 }
  0xae   : > { %4575 = vst [vmem:[#allocation22_spill] sm:$0xff] %v3186_v55  ;;  %v3190_v28 = vpop.permute.xlu0 %304  ;;  %v3211_v55 = vld [vmem:[%s2926_s19 + $0x4a] sm:$0xff] }
  0xaf   : > { %4576 = vst [vmem:[#allocation23_spill] sm:$0xff] %v3188_v57 }
  0xb0   : > { %4577 = vst [vmem:[#allocation24_spill] sm:$0xff] %v3190_v28 }
  0xb1   : > { %4582 = vst [vmem:[#allocation29_spill] sm:$0xff] %v3211_v55 }
  0xb3   : > { %721 = vperm.xlu2 %2842, %v3193_v29   ;;  %716 = vperm.xlu1 %2841, %v3196_v63   ;;  %v3232_v29 = vld [vmem:[%s2926_s19 + $0x5a] sm:$0xff] }
  0xb4   : > { %711 = vperm.xlu0 %2840, %v3199_v41   ;;  %4589 = vst [vmem:[#allocation36_spill] sm:$0xff] %v3232_v29 }
  0xb5   : > { %v3204_v45 = vpop.permute.xlu2 %465  ;;  %v3206_v57 = vpop.permute.xlu1 %324 }
  0xb6   : > { %4579 = vst [vmem:[#allocation26_spill] sm:$0xff] %v3204_v45  ;;  %v3208_v28 = vpop.permute.xlu0 %319 }
  0xb7   : > { %4580 = vst [vmem:[#allocation27_spill] sm:$0xff] %v3206_v57 }
  0xb8   : > { %4581 = vst [vmem:[#allocation28_spill] sm:$0xff] %v3208_v28 }
  0xbb   : > { %736 = vperm.xlu2 %2842, %v3211_v55   ;;  %731 = vperm.xlu1 %2841, %v3214_v37   ;;  %v3247_v55 = vld [vmem:[%s2926_s19 + $0x7a] sm:$0xff]  ;;  %v3253_v37 = vld [vmem:[%s2926_s19 + $0x6a] sm:$0xff] }
  0xbc   : > { %726 = vperm.xlu0 %2840, %v3217_v56   ;;  %4594 = vst [vmem:[#allocation41_spill] sm:$0xff] %v3247_v55  ;;  %v3250_v56 = vld [vmem:[%s2926_s19 + $0x72] sm:$0xff] }
  0xbd   : > { %v3222_v45 = vpop.permute.xlu2 %480  ;;  %v3224_v57 = vpop.permute.xlu1 %339  ;;  %4595 = vst [vmem:[#allocation42_spill] sm:$0xff] %v3250_v56 }
  0xbe   : > { %4585 = vst [vmem:[#allocation32_spill] sm:$0xff] %v3222_v45  ;;  %v3226_v28 = vpop.permute.xlu0 %334 }
  0xbf   : > { %4586 = vst [vmem:[#allocation33_spill] sm:$0xff] %v3224_v57 }
  0xc0   : > { %4587 = vst [vmem:[#allocation34_spill] sm:$0xff] %v3226_v28 }
  0xc1   : > { %4596 = vst [vmem:[#allocation43_spill] sm:$0xff] %v3253_v37 }
  0xc3   : > { %751 = vperm.xlu2 %2842, %v3229_v51   ;;  %746 = vperm.xlu1 %2841, %v3232_v29   ;;  %v3265_v51 = vld [vmem:[%s2926_s19 + $0x92] sm:$0xff]  ;;  %v3271_v29 = vld [vmem:[%s2926_s19 + $0x82] sm:$0xff] }
  0xc4   : > { %741 = vperm.xlu0 %2840, %v3235_v61   ;;  %4600 = vst [vmem:[#allocation47_spill] sm:$0xff] %v3265_v51  ;;  %v3268_v61 = vld [vmem:[%s2926_s19 + $0x8a] sm:$0xff] }
  0xc5   : > { %v3240_v45 = vpop.permute.xlu2 %495  ;;  %v3242_v57 = vpop.permute.xlu1 %354  ;;  %4601 = vst [vmem:[#allocation48_spill] sm:$0xff] %v3268_v61 }
  0xc6   : > { %4591 = vst [vmem:[#allocation38_spill] sm:$0xff] %v3240_v45  ;;  %v3244_v28 = vpop.permute.xlu0 %349 }
  0xc7   : > { %4592 = vst [vmem:[#allocation39_spill] sm:$0xff] %v3242_v57 }
  0xc8   : > { %4593 = vst [vmem:[#allocation40_spill] sm:$0xff] %v3244_v28 }
  0xc9   : > { %4602 = vst [vmem:[#allocation49_spill] sm:$0xff] %v3271_v29 }
  0xcb   : > { %766 = vperm.xlu2 %2842, %v3247_v55   ;;  %761 = vperm.xlu1 %2841, %v3250_v56   ;;  %v3283_v55 = vld [vmem:[%s2926_s19 + $0xaa] sm:$0xff]  ;;  %v3289_v56 = vld [vmem:[%s2926_s19 + $0x9a] sm:$0xff] }
  0xcc   : > { %756 = vperm.xlu0 %2840, %v3253_v37   ;;  %4606 = vst [vmem:[#allocation53_spill] sm:$0xff] %v3283_v55  ;;  %v3286_v37 = vld [vmem:[%s2926_s19 + $0xa2] sm:$0xff] }
  0xcd   : > { %v3258_v45 = vpop.permute.xlu2 %510  ;;  %v3260_v57 = vpop.permute.xlu1 %460  ;;  %4607 = vst [vmem:[#allocation54_spill] sm:$0xff] %v3286_v37 }
  0xce   : > { %4597 = vst [vmem:[#allocation44_spill] sm:$0xff] %v3258_v45  ;;  %v3262_v28 = vpop.permute.xlu0 %364 }
  0xcf   : > { %4598 = vst [vmem:[#allocation45_spill] sm:$0xff] %v3260_v57 }
  0xd0   : > { %4599 = vst [vmem:[#allocation46_spill] sm:$0xff] %v3262_v28 }
  0xd1   : > { %4608 = vst [vmem:[#allocation55_spill] sm:$0xff] %v3289_v56 }
  0xd3   : > { %781 = vperm.xlu2 %2842, %v3265_v51   ;;  %776 = vperm.xlu1 %2841, %v3268_v61   ;;  %v3301_v51 = vld [vmem:[%s2926_s19 + $0xc2] sm:$0xff]  ;;  %v3307_v61 = vld [vmem:[%s2926_s19 + $0xb2] sm:$0xff] }
  0xd4   : > { %771 = vperm.xlu0 %2840, %v3271_v29   ;;  %4612 = vst [vmem:[#allocation59_spill] sm:$0xff] %v3301_v51  ;;  %v3304_v29 = vld [vmem:[%s2926_s19 + $0xba] sm:$0xff] }
  0xd5   : > { %v3276_v45 = vpop.permute.xlu2 %525  ;;  %v3278_v57 = vpop.permute.xlu1 %475  ;;  %4613 = vst [vmem:[#allocation60_spill] sm:$0xff] %v3307_v61 }
  0xd6   : > { %4603 = vst [vmem:[#allocation50_spill] sm:$0xff] %v3276_v45  ;;  %v3280_v28 = vpop.permute.xlu0 %470 }
  0xd7   : > { %4604 = vst [vmem:[#allocation51_spill] sm:$0xff] %v3278_v57 }
  0xd8   : > { %4605 = vst [vmem:[#allocation52_spill] sm:$0xff] %v3280_v28 }
  0xdb   : > { %796 = vperm.xlu2 %2842, %v3283_v55   ;;  %791 = vperm.xlu1 %2841, %v3286_v37   ;;  %v3325_v37 = vld [vmem:[%s2926_s19 + $0xca] sm:$0xff] }
  0xdc   : > { %786 = vperm.xlu0 %2840, %v3289_v56  }
  0xdd   : > { %v3294_v45 = vpop.permute.xlu2 %540  ;;  %v3296_v57 = vpop.permute.xlu1 %490 }
  0xde   : > { %4609 = vst [vmem:[#allocation56_spill] sm:$0xff] %v3294_v45  ;;  %v3298_v28 = vpop.permute.xlu0 %485 }
  0xdf   : > { %4610 = vst [vmem:[#allocation57_spill] sm:$0xff] %v3296_v57  ;;  %v3319_v57 = vld [vmem:[%s2926_s19 + $0xda] sm:$0xff] }
  0xe0   : > { %4611 = vst [vmem:[#allocation58_spill] sm:$0xff] %v3298_v28  ;;  %v3322_v28 = vld [vmem:[%s2926_s19 + $0xd2] sm:$0xff] }
  0xe1   : > { %4617 = vst [vmem:[#allocation64_spill] sm:$0xff] %v3319_v57 }
  0xe3   : > { %811 = vperm.xlu2 %2842, %v3301_v51   ;;  %806 = vperm.xlu1 %2841, %v3304_v29  }
  0xe4   : > { %801 = vperm.xlu0 %2840, %v3307_v61  }
  0xe5   : > { %v3312_v55 = vpop.permute.xlu2 %555  ;;  %v3314_v56 = vpop.permute.xlu1 %505 }
  0xe6   : > { %4614 = vst [vmem:[#allocation61_spill] sm:$0xff] %v3312_v55  ;;  %v3316_v45 = vpop.permute.xlu0 %500 }
  0xe7   : > { %4615 = vst [vmem:[#allocation62_spill] sm:$0xff] %v3314_v56 }
  0xe8   : > { %4616 = vst [vmem:[#allocation63_spill] sm:$0xff] %v3316_v45 }
  0xeb   : > { %826 = vperm.xlu2 %2842, %v3319_v57   ;;  %821 = vperm.xlu1 %2841, %v3322_v28  }
  0xec   : > { %816 = vperm.xlu0 %2840, %v3325_v37  }
  0xed   : > { %v3330_v51 = vpop.permute.xlu2 %570  ;;  %v3332_v61 = vpop.permute.xlu1 %520 }
  0xee   : > { %4618 = vst [vmem:[#allocation65_spill] sm:$0xff] %v3332_v61  ;;  %v3334_v55 = vpop.permute.xlu0 %515 }
  0xef   : > { %4619 = vst [vmem:[#allocation66_spill] sm:$0xff] %v3334_v55 }
  0xf3   : > { %932 = vperm.xlu2 %2842, %v2929_v1   ;;  %927 = vperm.xlu1 %2841, %v2941_v5  }
  0xf4   : > { %922 = vperm.xlu0 %2840, %v2932_v2  }
  0xf5   : > { %v3339_v45 = vpop.permute.xlu2 %585  ;;  %v3341_v56 = vpop.permute.xlu1 %535 }
  0xf6   : > { %v3343_v57 = vpop.permute.xlu0 %530 }
  0xf7   : > { %4620 = vst [vmem:[#allocation67_spill] sm:$0xff] %v3343_v57 }
  0xfb   : > { %947 = vperm.xlu2 %2842, %v2950_v8   ;;  %942 = vperm.xlu1 %2841, %v2953_v9  }
  0xfc   : > { %937 = vperm.xlu0 %2840, %v2938_v4  }
  0xfd   : > { %v3348_v61 = vpop.permute.xlu2 %691  ;;  %v3350_v55 = vpop.permute.xlu1 %550 }
  0xfe   : > { %4621 = vst [vmem:[#allocation68_spill] sm:$0xff] %v3350_v55  ;;  %v3352_v1 = vpop.permute.xlu0 %545 }
  0xff   : > { %4622 = vst [vmem:[#allocation69_spill] sm:$0xff] %v3352_v1 }
 0x103   : > { %962 = vperm.xlu2 %2842, %v2962_v11   ;;  %957 = vperm.xlu1 %2841, %v2965_v12  }
 0x104   : > { %952 = vperm.xlu0 %2840, %v2947_v7  }
 0x105   : > { %v3357_v2 = vpop.permute.xlu2 %706  ;;  %v3359_v5 = vpop.permute.xlu1 %565 }
 0x106   : > { %v3361_v8 = vpop.permute.xlu0 %560 }
 0x107   : > { %4623 = vst [vmem:[#allocation70_spill] sm:$0xff] %v3361_v8 }
 0x10b   : > { %977 = vperm.xlu2 %2842, %v2974_v14   ;;  %972 = vperm.xlu1 %2841, %v2977_v15  }
 0x10c   : > { %967 = vperm.xlu0 %2840, %v2959_v10  }
 0x10d   : > { %v3366_v4 = vpop.permute.xlu2 %721  ;;  %v3368_v9 = vpop.permute.xlu1 %580 }
 0x10e   : > { %v3370_v11 = vpop.permute.xlu0 %575 }
 0x113   : > { %992 = vperm.xlu2 %2842, %v2986_v17   ;;  %987 = vperm.xlu1 %2841, %v2989_v18  }
 0x114   : > { %982 = vperm.xlu0 %2840, %v2971_v13  }
 0x115   : > { %v3375_v7 = vpop.permute.xlu2 %736  ;;  %v3377_v12 = vpop.permute.xlu1 %595 }
 0x116   : > { %v3379_v14 = vpop.permute.xlu0 %590 }
 0x11b   : > { %1007 = vperm.xlu2 %2842, %v2998_v20   ;;  %1002 = vperm.xlu1 %2841, %v3001_v21  }
 0x11c   : > { %997 = vperm.xlu0 %2840, %v2983_v16  }
 0x11d   : > { %v3384_v10 = vpop.permute.xlu2 %751  ;;  %v3386_v15 = vpop.permute.xlu1 %701 }
 0x11e   : > { %v3388_v17 = vpop.permute.xlu0 %696 }
 0x123   : > { %1022 = vperm.xlu2 %2842, %v3010_v23   ;;  %1017 = vperm.xlu1 %2841, %v3013_v24  }
 0x124   : > { %1012 = vperm.xlu0 %2840, %v2995_v19   ;;  %v3409_v19 = vld [vmem:[%s2926_s19 + $0xe0] sm:$0xff] }
 0x125   : > { %v3393_v13 = vpop.permute.xlu2 %766  ;;  %v3395_v18 = vpop.permute.xlu1 %716  ;;  %4627 = vst [vmem:[#allocation74_spill] sm:$0xff] %v3409_v19 }
 0x126   : > { %v3397_v20 = vpop.permute.xlu0 %711 }
 0x12b   : > { %1037 = vperm.xlu2 %2842, %v3022_v26   ;;  %1032 = vperm.xlu1 %2841, %v3025_v27  }
 0x12c   : > { %1027 = vperm.xlu0 %2840, %v3007_v22   ;;  %v3421_v22 = vld [vmem:[%s2926_s19 + $0xe8] sm:$0xff] }
 0x12d   : > { %v3402_v16 = vpop.permute.xlu2 %781  ;;  %v3404_v21 = vpop.permute.xlu1 %731  ;;  %4630 = vst [vmem:[#allocation77_spill] sm:$0xff] %v3421_v22 }
 0x12e   : > { %4624 = vst [vmem:[#allocation71_spill] sm:$0xff] %v3402_v16  ;;  %v3406_v23 = vpop.permute.xlu0 %726  ;;  %v4679_v16 = vld [vmem:[#allocation64_spill] sm:$0xff] }
 0x12f   : > { %4625 = vst [vmem:[#allocation72_spill] sm:$0xff] %v3404_v21 }
 0x130   : > { %4626 = vst [vmem:[#allocation73_spill] sm:$0xff] %v3406_v23 }
 0x133   : > { %1052 = vperm.xlu2 %2842, %v3409_v19   ;;  %1047 = vperm.xlu1 %2841, %v3033_v30  }
 0x134   : > { %1042 = vperm.xlu0 %2840, %v3019_v25  }
 0x135   : > { %v3414_v24 = vpop.permute.xlu2 %796  ;;  %v3416_v26 = vpop.permute.xlu1 %746 }
 0x136   : > { %4628 = vst [vmem:[#allocation75_spill] sm:$0xff] %v3416_v26  ;;  %v3418_v27 = vpop.permute.xlu0 %741 }
 0x137   : > { %4629 = vst [vmem:[#allocation76_spill] sm:$0xff] %v3418_v27  ;;  %v4669_v27 = vld [vmem:[#allocation47_spill] sm:$0xff] }
 0x13b   : > { %1158 = vperm.xlu2 %2842, %v3040_v32   ;;  %1153 = vperm.xlu1 %2841, %v3043_v33  }
 0x13c   : > { %1057 = vperm.xlu0 %2840, %v3421_v22  }
 0x13d   : > { %v3426_v8 = vpop.permute.xlu2 %811  ;;  %v3428_v1 = vpop.permute.xlu1 %761 }
 0x13e   : > { %4631 = vst [vmem:[#allocation78_spill] sm:$0xff] %v3428_v1  ;;  %v3430_v30 = vpop.permute.xlu0 %756  ;;  %v4661_v1 = vld [vmem:[#allocation35_spill] sm:$0xff] }
 0x13f   : > { %4632 = vst [vmem:[#allocation79_spill] sm:$0xff] %v3430_v30 }
 0x143   : > { %1173 = vperm.xlu2 %2842, %v3052_v35   ;;  %1168 = vperm.xlu1 %2841, %v3055_v36  }
 0x144   : > { %1163 = vperm.xlu0 %2840, %v3037_v31  }
 0x145   : > { %v3435_v25 = vpop.permute.xlu2 %826  ;;  %v3437_v19 = vpop.permute.xlu1 %776 }
 0x146   : > { %4633 = vst [vmem:[#allocation80_spill] sm:$0xff] %v3437_v19  ;;  %v3439_v32 = vpop.permute.xlu0 %771 }
 0x147   : > { %4634 = vst [vmem:[#allocation81_spill] sm:$0xff] %v3439_v32 }
 0x14b   : > { %1188 = vperm.xlu2 %2842, %v3066_v39   ;;  %1183 = vperm.xlu1 %2841, %v3069_v40  }
 0x14c   : > { %1178 = vperm.xlu0 %2840, %v3049_v34  }
 0x14d   : > { %v3444_v33 = vpop.permute.xlu2 %932  ;;  %v3446_v30 = vpop.permute.xlu1 %791 }
 0x14e   : > { %4635 = vst [vmem:[#allocation82_spill] sm:$0xff] %v3446_v30  ;;  %v3448_v35 = vpop.permute.xlu0 %786 }
 0x14f   : > { %4636 = vst [vmem:[#allocation83_spill] sm:$0xff] %v3448_v35 }
 0x153   : > { %1203 = vperm.xlu2 %2842, %v3080_v43   ;;  %1198 = vperm.xlu1 %2841, %v3083_v44  }
 0x154   : > { %1193 = vperm.xlu0 %2840, %v3063_v38  }
 0x155   : > { %v3453_v31 = vpop.permute.xlu2 %947  ;;  %v3455_v36 = vpop.permute.xlu1 %806 }
 0x156   : > { %4637 = vst [vmem:[#allocation84_spill] sm:$0xff] %v3453_v31  ;;  %v3457_v39 = vpop.permute.xlu0 %801 }
 0x15b   : > { %1218 = vperm.xlu2 %2842, %v3094_v47   ;;  %1213 = vperm.xlu1 %2841, %v3097_v48  }
 0x15c   : > { %1208 = vperm.xlu0 %2840, %v3077_v42  }
 0x15d   : > { %v3462_v34 = vpop.permute.xlu2 %962  ;;  %v3464_v40 = vpop.permute.xlu1 %821 }
 0x15e   : > { %4638 = vst [vmem:[#allocation85_spill] sm:$0xff] %v3462_v34  ;;  %v3466_v43 = vpop.permute.xlu0 %816  ;;  %v2696_v34 = vld [vmem:[%s2926_s19 + $0xea] sm:$0xff] }
 0x163   : > { %1233 = vperm.xlu2 %2842, %v3112_v53   ;;  %1228 = vperm.xlu1 %2841, %v3115_v54  }
 0x164   : > { %1223 = vperm.xlu0 %2840, %v3091_v46  }
 0x165   : > { %v3471_v38 = vpop.permute.xlu2 %977  ;;  %v3473_v44 = vpop.permute.xlu1 %927 }
 0x166   : > { %4639 = vst [vmem:[#allocation86_spill] sm:$0xff] %v3471_v38  ;;  %v3475_v47 = vpop.permute.xlu0 %922 }
 0x16b   : > { %1248 = vperm.xlu2 %2842, %v3130_v59   ;;  %1243 = vperm.xlu1 %2841, %v3133_v60  }
 0x16c   : > { %1238 = vperm.xlu0 %2840, %v3109_v52  }
 0x16d   : > { %v3480_v42 = vpop.permute.xlu2 %992  ;;  %v3482_v48 = vpop.permute.xlu1 %942 }
 0x16e   : > { %4640 = vst [vmem:[#allocation87_spill] sm:$0xff] %v3480_v42  ;;  %v3484_v53 = vpop.permute.xlu0 %937 }
 0x16f   : > { %4641 = vst [vmem:[#allocation88_spill] sm:$0xff] %v3482_v48  ;;  %v2698_v48 = vld [vmem:[%s2926_s19 + $0x20] sm:$0xff] }
 0x173   : > { %1263 = vperm.xlu2 %2842, %v3148_v3   ;;  %1258 = vperm.xlu1 %2841, %v3151_v6   ;;  %v2667_v6 = vld [vmem:[%s2926_s19 + $0xe9] sm:$0xff] }
 0x174   : > { %1253 = vperm.xlu0 %2840, %v3127_v58   ;;  %v2666_v58 = vld [vmem:[%s2926_s19 + $0xe1] sm:$0xff] }
 0x175   : > { %v3489_v46 = vpop.permute.xlu2 %1007  ;;  %v3491_v54 = vpop.permute.xlu1 %957 }
 0x176   : > { %4642 = vst [vmem:[#allocation89_spill] sm:$0xff] %v3489_v46  ;;  %v3493_v59 = vpop.permute.xlu0 %952 }
 0x177   : > { %4643 = vst [vmem:[#allocation90_spill] sm:$0xff] %v3491_v54  ;;  %v3603_v54 = vld [vmem:[%s4531_s1 + $0x3] ss:$0 sm:$0xff] }
 0x17b   : > { %1278 = vperm.xlu2 %2842, %v3164_v49   ;;  %1273 = vperm.xlu1 %2841, %v3167_v62   ;;  %v4647_v62 = vld [vmem:[#allocation21_spill] sm:$0xff] }
 0x17c   : > { %1268 = vperm.xlu0 %2840, %v3145_v0  }
 0x17d   : > { %v3498_v52 = vpop.permute.xlu2 %1022  ;;  %v3500_v60 = vpop.permute.xlu1 %972 }
 0x17e   : > { %4644 = vst [vmem:[#allocation91_spill] sm:$0xff] %v3498_v52  ;;  %v3502_v3 = vpop.permute.xlu0 %967 }
 0x17f   : > { %4645 = vst [vmem:[#allocation92_spill] sm:$0xff] %v3500_v60 }
 0x183   : > { %1384 = vperm.xlu2 %2842, %v3181_v50   ;;  %1288 = vperm.xlu1 %2841, %v2667_v6   ;;  %v4650_v50 = vld [vmem:[#allocation30_spill] sm:$0xff]  ;;  %v4651_v6 = vld [vmem:[#allocation31_spill] sm:$0xff] }
 0x184   : > { %1283 = vperm.xlu0 %2840, %v2666_v58   ;;  %v4652_v58 = vld [vmem:[#allocation25_spill] sm:$0xff] }
 0x185   : > { %v3507_v35 = vpop.permute.xlu2 %1037  ;;  %v3509_v30 = vpop.permute.xlu1 %987 }
 0x186   : > { %4646 = vst [vmem:[#allocation93_spill] sm:$0xff] %v3509_v30  ;;  %v3511_v49 = vpop.permute.xlu0 %982  ;;  %v4657_v30 = vld [vmem:[#allocation29_spill] sm:$0xff] }
 0x18b   : > { %1399 = vperm.xlu2 %2842, %v3196_v63   ;;  %1394 = vperm.xlu1 %2841, %v3199_v41   ;;  %v4655_v41 = vld [vmem:[#allocation36_spill] sm:$0xff] }
 0x18c   : > { %1389 = vperm.xlu0 %2840, %v4647_v62   ;;  %v4656_v62 = vld [vmem:[#allocation37_spill] sm:$0xff] }
 0x18d   : > { %v3516_v0 = vpop.permute.xlu2 %1052  ;;  %v3518_v52 = vpop.permute.xlu1 %1002 }
 0x18e   : > { %4648 = vst [vmem:[#allocation21_spill] sm:$0xff] %v3518_v52  ;;  %v3520_v46 = vpop.permute.xlu0 %997 }
 0x18f   : > { %4649 = vst [vmem:[#allocation94_spill] sm:$0xff] %v3520_v46 }
 0x193   : > { %1414 = vperm.xlu2 %2842, %v4650_v50   ;;  %1409 = vperm.xlu1 %2841, %v4651_v6   ;;  %v4659_v6 = vld [vmem:[#allocation42_spill] sm:$0xff] }
 0x194   : > { %1404 = vperm.xlu0 %2840, %v4652_v58   ;;  %v4660_v58 = vld [vmem:[#allocation43_spill] sm:$0xff] }
 0x195   : > { %v3525_v32 = vpop.permute.xlu2 %1158  ;;  %v3527_v19 = vpop.permute.xlu1 %1017 }
 0x196   : > { %4653 = vst [vmem:[#allocation30_spill] sm:$0xff] %v3527_v19  ;;  %v3529_v63 = vpop.permute.xlu0 %1012 }
 0x197   : > { %4654 = vst [vmem:[#allocation31_spill] sm:$0xff] %v3529_v63 }
 0x19b   : > { %1429 = vperm.xlu2 %2842, %v4655_v41   ;;  %1424 = vperm.xlu1 %2841, %v4656_v62   ;;  %v4663_v41 = vld [vmem:[#allocation48_spill] sm:$0xff]  ;;  %v4664_v62 = vld [vmem:[#allocation49_spill] sm:$0xff] }
 0x19c   : > { %1419 = vperm.xlu0 %2840, %v4657_v30   ;;  %v4665_v30 = vld [vmem:[#allocation41_spill] sm:$0xff] }
 0x19d   : > { %v3534_v52 = vpop.permute.xlu2 %1173  ;;  %v1033_v42 = vpop.permute.xlu1 %1032 }
 0x19e   : > { %4658 = vst [vmem:[#allocation25_spill] sm:$0xff] %v3534_v52  ;;  %v3536_v50 = vpop.permute.xlu0 %1027  ;;  %v1085_v21 = vmul.f32 %v3603_v54, %v1033_v42 }
 0x1a3   : > { %1444 = vperm.xlu2 %2842, %v4659_v6   ;;  %1439 = vperm.xlu1 %2841, %v4660_v58   ;;  %v4667_v58 = vld [vmem:[#allocation54_spill] sm:$0xff] }
 0x1a4   : > { %1434 = vperm.xlu0 %2840, %v4661_v1   ;;  %v4668_v1 = vld [vmem:[#allocation55_spill] sm:$0xff] }
 0x1a5   : > { %v3541_v19 = vpop.permute.xlu2 %1188  ;;  %v1048_v57 = vpop.permute.xlu1 %1047 }
 0x1a6   : > { %4662 = vst [vmem:[#allocation36_spill] sm:$0xff] %v3541_v19  ;;  %v3543_v22 = vpop.permute.xlu0 %1042  ;;  %v1088_v31 = vmul.f32 %v3603_v54, %v1048_v57 }
 0x1ab   : > { %1459 = vperm.xlu2 %2842, %v4663_v41   ;;  %1454 = vperm.xlu1 %2841, %v4664_v62   ;;  %v4671_v62 = vld [vmem:[#allocation60_spill] sm:$0xff] }
 0x1ac   : > { %1449 = vperm.xlu0 %2840, %v4665_v30   ;;  %v4672_v30 = vld [vmem:[#allocation53_spill] sm:$0xff] }
 0x1ad   : > { %v3548_v60 = vpop.permute.xlu2 %1203  ;;  %v3550_v38 = vpop.permute.xlu1 %1153 }
 0x1ae   : > { %4666 = vst [vmem:[#allocation37_spill] sm:$0xff] %v3548_v60  ;;  %v3552_v6 = vpop.permute.xlu0 %1057 }
 0x1b3   : > { %1474 = vperm.xlu2 %2842, %v4667_v58   ;;  %1469 = vperm.xlu1 %2841, %v4668_v1  }
 0x1b4   : > { %1464 = vperm.xlu0 %2840, %v4669_v27   ;;  %v4675_v27 = vld [vmem:[#allocation59_spill] sm:$0xff] }
 0x1b5   : > { %v3557_v26 = vpop.permute.xlu2 %1218  ;;  %v3559_v19 = vpop.permute.xlu1 %1168 }
 0x1b6   : > { %4670 = vst [vmem:[#allocation29_spill] sm:$0xff] %v3557_v26  ;;  %v3561_v41 = vpop.permute.xlu0 %1163 }
 0x1bb   : > { %1489 = vperm.xlu2 %2842, %v3304_v29   ;;  %1484 = vperm.xlu1 %2841, %v4671_v62   ;;  %v3577_v29 = vld [vmem:[%s4531_s1 + $0x1] ss:$0 sm:$0xff] }
 0x1bc   : > { %1479 = vperm.xlu0 %2840, %v4672_v30  }
 0x1bd   : > { %v3566_v60 = vpop.permute.xlu2 %1233  ;;  %v3568_v58 = vpop.permute.xlu1 %1183 }
 0x1be   : > { %4673 = vst [vmem:[#allocation42_spill] sm:$0xff] %v3566_v60  ;;  %v3570_v1 = vpop.permute.xlu0 %1178  ;;  %v3587_v60 = vld [vmem:[%s4531_s1] ss:$0 sm:$0xff] }
 0x1bf   : > { %4674 = vst [vmem:[#allocation43_spill] sm:$0xff] %v3570_v1  ;;  %v2699_v1 = vld [vmem:[%s2926_s19 + $0x28] sm:$0xff] }
 0x1c3   : > { %1504 = vperm.xlu2 %2842, %v3322_v28   ;;  %1499 = vperm.xlu1 %2841, %v3325_v37   ;;  %v623_v28 = vmul.f32 %v3577_v29, %v3330_v51  ;;  %v3594_v37 = vld [vmem:[%s4531_s1 + $0x2] ss:$0 sm:$0xff] }
 0x1c4   : > { %1494 = vperm.xlu0 %2840, %v4675_v27   ;;  %v4678_v27 = vld [vmem:[#allocation33_spill] sm:$0xff]  ;;  %v854_v63 = vmul.f32 %v3594_v37, %v3457_v39  ;;  %v2695_v51 = vld [vmem:[%s2926_s19 + $0xe2] sm:$0xff] }
 0x1c5   : > { %v3580_v62 = vpop.permute.xlu2 %1248  ;;  %v3582_v30 = vpop.permute.xlu1 %1198 }
 0x1c6   : > { %4676 = vst [vmem:[#allocation35_spill] sm:$0xff] %v3580_v62  ;;  %v3596_v26 = vpop.permute.xlu0 %1193  ;;  %v392_v62 = vmul.f32 %v3587_v60, %v4678_v27  ;;  %v3613_v27 = vld [vmem:[%s4531_s1 + $0x4] ss:$0 sm:$0xff] }
 0x1c7   : > { %4677 = vst [vmem:[#allocation48_spill] sm:$0xff] %v3596_v26 }
 0x1c8   : > { %v651_v23 = vadd.f32 %v623_v28, %v392_v62  ;;  %v626_v62 = vmul.f32 %v3577_v29, %v3339_v45  ;;  %v4682_v45 = vld [vmem:[#allocation45_spill] sm:$0xff] }
 0x1ca   : > { %v882_v26 = vadd.f32 %v854_v63, %v651_v23  ;;  %v857_v63 = vmul.f32 %v3594_v37, %v3466_v43 }
 0x1cb   : > { %1519 = vperm.xlu2 %2842, %v2696_v34   ;;  %1514 = vperm.xlu1 %2841, %v2695_v51   ;;  %v4680_v51 = vld [vmem:[#allocation39_spill] sm:$0xff] }
 0x1cc   : > { %1509 = vperm.xlu0 %2840, %v4679_v16   ;;  %v1113_v28 = vadd.f32 %v1085_v21, %v882_v26  ;;  %v395_v23 = vmul.f32 %v3587_v60, %v4680_v51  ;;  %v2700_v16 = vld [vmem:[%s2926_s19 + $0x30] sm:$0xff]  ;;  %v601_v21 = vmul.f32 %v3577_v29, %v4682_v45  ;;  %v2701_v45 = vld [vmem:[%s2926_s19 + $0x38] sm:$0xff] }
 0x1cd   : > { %v1264_v52 = vpop.permute.xlu2 %1263  ;;  %v3616_v39 = vpop.permute.xlu1 %1213 }
 0x1ce   : > { %v1316_v42 = vmul.f32 %v3613_v27, %v1264_v52  ;;  %v3621_v34 = vpop.permute.xlu0 %1208  ;;  %v654_v46 = vadd.f32 %v626_v62, %v395_v23  ;;  %v832_v62 = vmul.f32 %v3594_v37, %v3348_v61  ;;  %v3656_v61 = vld [vmem:[%s4531_s1 + $0x5] ss:$0 sm:$0xff] }
 0x1d0   : > { %v3627_v55 = vadd.f32 %v1316_v42, %v1113_v28  ;;  %v885_v26 = vadd.f32 %v857_v63, %v654_v46  ;;  %v4683_v28 = vld [vmem:[#allocation8_spill] sm:$0xff]  ;;  %v2702_v63 = vld [vmem:[%s2926_s19 + $0x40] sm:$0xff] }
 0x1d1   : > { %v370_v42 = vmul.f32 %v3587_v60, %v4683_v28  ;;  %v1294_v28 = vmul.f32 %v3613_v27, %v3550_v38 }
 0x1d2   : > { %4681 = vst [vmem:[#allocation49_spill] sm:$0xff] %v3627_v55  ;;  %v1116_v57 = vadd.f32 %v1088_v31, %v885_v26  ;;  %v4685_v31 = vld [vmem:[#allocation51_spill] sm:$0xff]  ;;  %v4686_v26 = vld [vmem:[#allocation10_spill] sm:$0xff] }
 0x1d3   : > { %1625 = vperm.xlu2 %2842, %v2700_v16   ;;  %1620 = vperm.xlu1 %2841, %v2699_v1   ;;  %v629_v1 = vadd.f32 %v601_v21, %v370_v42  ;;  %v1063_v16 = vmul.f32 %v3603_v54, %v3475_v47  ;;  %v604_v21 = vmul.f32 %v3577_v29, %v4685_v31 }
 0x1d4   : > { %1615 = vperm.xlu0 %2840, %v2698_v48   ;;  %v2703_v48 = vld [vmem:[%s2926_s19 + $0x48] sm:$0xff]  ;;  %v1066_v31 = vmul.f32 %v3603_v54, %v3484_v53 }
 0x1d5   : > { %v1279_v52 = vpop.permute.xlu2 %1278  ;;  %v3635_v43 = vpop.permute.xlu1 %1228  ;;  %v860_v55 = vadd.f32 %v832_v62, %v629_v1  ;;  %v835_v62 = vmul.f32 %v3594_v37, %v3357_v2  ;;  %v2706_v2 = vld [vmem:[%s2926_s19 + $0x60] sm:$0xff] }
 0x1d6   : > { %v1319_v51 = vmul.f32 %v3613_v27, %v1279_v52  ;;  %v3642_v23 = vpop.permute.xlu0 %1223  ;;  %v373_v52 = vmul.f32 %v3587_v60, %v4686_v26 }
 0x1d7   : > { %v1091_v47 = vadd.f32 %v1063_v16, %v860_v55  ;;  %v4687_v55 = vld [vmem:[#allocation34_spill] sm:$0xff] }
 0x1d8   : > { %v3646_v46 = vadd.f32 %v1319_v51, %v1116_v57  ;;  %v622_v57 = vmul.f32 %v3577_v29, %v3359_v5  ;;  %v391_v16 = vmul.f32 %v3587_v60, %v4687_v55  ;;  %v2704_v5 = vld [vmem:[%s2926_s19 + $0x50] sm:$0xff]  ;;  %v1297_v55 = vmul.f32 %v3613_v27, %v3559_v19 }
 0x1d9   : > { %v1322_v51 = vadd.f32 %v1294_v28, %v1091_v47  ;;  %v838_v19 = vmul.f32 %v3594_v37, %v3366_v4  ;;  %v4695_v4 = vld [vmem:[#allocation40_spill] sm:$0xff] }
 0x1da   : > { %4684 = vst [vmem:[#allocation41_spill] sm:$0xff] %v3646_v46  ;;  %v2705_v46 = vld [vmem:[%s2926_s19 + $0x58] sm:$0xff]  ;;  %v650_v47 = vadd.f32 %v622_v57, %v391_v16 }
 0x1db   : > { %1640 = vperm.xlu2 %2842, %v2703_v48   ;;  %1635 = vperm.xlu1 %2841, %v2702_v63   ;;  %v632_v63 = vadd.f32 %v604_v21, %v373_v52  ;;  %v4689_v21 = vld [vmem:[#allocation57_spill] sm:$0xff] }
 0x1dc   : > { %1630 = vperm.xlu0 %2840, %v2701_v45   ;;  %v853_v45 = vmul.f32 %v3594_v37, %v3414_v24  ;;  %v607_v52 = vmul.f32 %v3577_v29, %v4689_v21  ;;  %v4690_v24 = vld [vmem:[#allocation3_spill] sm:$0xff]  ;;  %v4694_v21 = vld [vmem:[#allocation5_spill] sm:$0xff] }
 0x1dd   : > { %v1385_v42 = vpop.permute.xlu2 %1384  ;;  %v3662_v38 = vpop.permute.xlu1 %1243  ;;  %v863_v28 = vadd.f32 %v835_v62, %v632_v63  ;;  %v3690_v53 = vmul.f32 %v3587_v60, %v4690_v24  ;;  %v4691_v62 = vld [vmem:[#allocation4_spill] sm:$0xff]  ;;  %v3708_v24 = vmul.f32 %v3587_v60, %v4694_v21  ;;  %v4697_v21 = vld [vmem:[#allocation7_spill] sm:$0xff] }
 0x1de   : > { %v1525_v1 = vmul.f32 %v3656_v61, %v1385_v42  ;;  %v3669_v48 = vpop.permute.xlu0 %1238  ;;  %v1084_v42 = vmul.f32 %v3603_v54, %v3536_v50  ;;  %v3694_v57 = vmul.f32 %v3587_v60, %v4691_v62  ;;  %v4692_v50 = vld [vmem:[#allocation14_spill] sm:$0xff] }
 0x1df   : > { %v376_v16 = vmul.f32 %v3587_v60, %v4692_v50  ;;  %v624_v50 = vmul.f32 %v3577_v29, %v3370_v11  ;;  %v4699_v11 = vld [vmem:[#allocation18_spill] sm:$0xff] }
 0x1e0   : > { %v3677_v26 = vadd.f32 %v1525_v1, %v1322_v51  ;;  %v881_v51 = vadd.f32 %v853_v45, %v650_v47  ;;  %v1094_v1 = vadd.f32 %v1066_v31, %v863_v28 }
 0x1e1   : > { %v635_v62 = vadd.f32 %v607_v52, %v376_v16  ;;  %v393_v16 = vmul.f32 %v3587_v60, %v4699_v11  ;;  %v4701_v11 = vld [vmem:[#allocation13_spill] sm:$0xff] }
 0x1e2   : > { %4688 = vst [vmem:[#allocation54_spill] sm:$0xff] %v3677_v26  ;;  %v1112_v45 = vadd.f32 %v1084_v42, %v881_v51  ;;  %v1325_v31 = vadd.f32 %v1297_v55, %v1094_v1  ;;  %v856_v42 = vmul.f32 %v3594_v37, %v3426_v8  ;;  %v1069_v55 = vmul.f32 %v3603_v54, %v3493_v59  ;;  %v2707_v59 = vld [vmem:[%s2926_s19 + $0x68] sm:$0xff] }
 0x1e3   : > { %1655 = vperm.xlu2 %2842, %v2706_v2   ;;  %1650 = vperm.xlu1 %2841, %v2705_v46   ;;  %v625_v46 = vmul.f32 %v3577_v29, %v3368_v9  ;;  %v394_v9 = vmul.f32 %v3587_v60, %v4695_v4  ;;  %v372_v26 = vmul.f32 %v3587_v60, %v4697_v21  ;;  %v4698_v4 = vld [vmem:[#allocation11_spill] sm:$0xff]  ;;  %v4700_v21 = vld [vmem:[#allocation62_spill] sm:$0xff] }
 0x1e4   : > { %1645 = vperm.xlu0 %2840, %v2704_v5   ;;  %v3728_v52 = vmul.f32 %v3587_v60, %v4698_v4  ;;  %v855_v8 = vmul.f32 %v3594_v37, %v3455_v36  ;;  %v652_v4 = vadd.f32 %v624_v50, %v393_v16  ;;  %v3745_v36 = vmul.f32 %v3587_v60, %v4701_v11 }
 0x1e5   : > { %v1400_v63 = vpop.permute.xlu2 %1399  ;;  %v1259_v2 = vpop.permute.xlu1 %1258  ;;  %v841_v50 = vmul.f32 %v3594_v37, %v3375_v7  ;;  %v627_v7 = vmul.f32 %v3577_v29, %v3379_v14 }
 0x1e6   : > { %v1528_v5 = vmul.f32 %v3656_v61, %v1400_v63  ;;  %v1315_v28 = vmul.f32 %v3613_v27, %v1259_v2  ;;  %v3704_v47 = vpop.permute.xlu0 %1253  ;;  %v2709_v63 = vld [vmem:[%s2926_s19 + $0x78] sm:$0xff]  ;;  %v2708_v2 = vld [vmem:[%s2926_s19 + $0x70] sm:$0xff] }
 0x1e7   : > { %4693 = vst [vmem:[#allocation55_spill] sm:$0xff] %v3704_v47  ;;  %v1086_v47 = vmul.f32 %v3603_v54, %v3507_v35  ;;  %v628_v35 = vmul.f32 %v3577_v29, %v3377_v12 }
 0x1e8   : > { %v3718_v51 = vadd.f32 %v1528_v5, %v1325_v31  ;;  %v3720_v1 = vadd.f32 %v1315_v28, %v1112_v45  ;;  %v866_v31 = vadd.f32 %v838_v19, %v635_v62  ;;  %v653_v5 = vadd.f32 %v625_v46, %v394_v9  ;;  %v4702_v19 = vld [vmem:[#allocation17_spill] sm:$0xff] }
 0x1e9   : > { %v1087_v45 = vmul.f32 %v3603_v54, %v3543_v22  ;;  %v1300_v28 = vmul.f32 %v3613_v27, %v3568_v58  ;;  %v379_v46 = vmul.f32 %v3587_v60, %v4702_v19  ;;  %v4703_v58 = vld [vmem:[#allocation46_spill] sm:$0xff]  ;;  %v2712_v19 = vld [vmem:[%s2926_s19 + $0x90] sm:$0xff] }
 0x1ea   : > { %4696 = vst [vmem:[#allocation47_spill] sm:$0xff] %v3718_v51  ;;  %v610_v51 = vmul.f32 %v3577_v29, %v4700_v21  ;;  %v884_v22 = vadd.f32 %v856_v42, %v653_v5  ;;  %v1097_v9 = vadd.f32 %v1069_v55, %v866_v31  ;;  %v397_v62 = vmul.f32 %v3587_v60, %v4703_v58 }
 0x1eb   : > { %1670 = vperm.xlu2 %2842, %v2709_v63   ;;  %1665 = vperm.xlu1 %2841, %v2708_v2   ;;  %v883_v63 = vadd.f32 %v855_v8, %v652_v4  ;;  %v859_v8 = vmul.f32 %v3594_v37, %v3435_v25  ;;  %v2710_v25 = vld [vmem:[%s2926_s19 + $0x80] sm:$0xff] }
 0x1ec   : > { %1660 = vperm.xlu0 %2840, %v2707_v59   ;;  %v1115_v21 = vadd.f32 %v1087_v45, %v884_v22  ;;  %v1328_v11 = vadd.f32 %v1300_v28, %v1097_v9  ;;  %v638_v31 = vadd.f32 %v610_v51, %v379_v46  ;;  %v1072_v45 = vmul.f32 %v3603_v54, %v3502_v3  ;;  %v2711_v22 = vld [vmem:[%s2926_s19 + $0x88] sm:$0xff]  ;;  %v4704_v9 = vld [vmem:[#allocation22_spill] sm:$0xff] }
 0x1ed   : > { %v1415_v2 = vpop.permute.xlu2 %1414  ;;  %v1274_v16 = vpop.permute.xlu1 %1273  ;;  %v1114_v5 = vadd.f32 %v1086_v47, %v883_v63  ;;  %v396_v51 = vmul.f32 %v3587_v60, %v4704_v9  ;;  %v4705_v46 = vld [vmem:[#allocation52_spill] sm:$0xff]  ;;  %v858_v47 = vmul.f32 %v3594_v37, %v3464_v40  ;;  %v656_v3 = vadd.f32 %v628_v35, %v397_v62 }
 0x1ee   : > { %v1531_v42 = vmul.f32 %v3656_v61, %v1415_v2  ;;  %v1318_v55 = vmul.f32 %v3613_v27, %v1274_v16  ;;  %v1269_v59 = vpop.permute.xlu0 %1268  ;;  %v603_v14 = vmul.f32 %v3577_v29, %v4705_v46  ;;  %v869_v63 = vadd.f32 %v841_v50, %v638_v31  ;;  %v4707_v40 = vld [vmem:[#allocation20_spill] sm:$0xff]  ;;  %v4708_v50 = vld [vmem:[#allocation26_spill] sm:$0xff] }
 0x1ef   : > { %v1317_v12 = vmul.f32 %v3613_v27, %v1269_v59  ;;  %v1090_v2 = vmul.f32 %v3603_v54, %v3552_v6  ;;  %v1303_v16 = vmul.f32 %v3613_v27, %v3582_v30  ;;  %v382_v59 = vmul.f32 %v3587_v60, %v4707_v40 }
 0x1f0   : > { %v3764_v28 = vadd.f32 %v1531_v42, %v1328_v11  ;;  %v3766_v4 = vadd.f32 %v1318_v55, %v1115_v21  ;;  %v4706_v21 = vld [vmem:[#allocation65_spill] sm:$0xff]  ;;  %v655_v42 = vadd.f32 %v627_v7, %v396_v51  ;;  %v1089_v55 = vmul.f32 %v3603_v54, %v3516_v0 }
 0x1f1   : > { %v3776_v58 = vadd.f32 %v1317_v12, %v1114_v5  ;;  %v613_v11 = vmul.f32 %v3577_v29, %v4706_v21  ;;  %v602_v62 = vmul.f32 %v3577_v29, %v4708_v50  ;;  %v887_v35 = vadd.f32 %v859_v8, %v656_v3  ;;  %v2714_v3 = vld [vmem:[%s2926_s19 + $0xa0] sm:$0xff] }
 0x1f2   : > { %v1100_v6 = vadd.f32 %v1072_v45, %v869_v63  ;;  %v631_v31 = vadd.f32 %v603_v14, %v372_v26  ;;  %v844_v30 = vmul.f32 %v3594_v37, %v3384_v10  ;;  %v834_v7 = vmul.f32 %v3594_v37, %v3386_v15  ;;  %v2715_v63 = vld [vmem:[%s2926_s19 + $0xa8] sm:$0xff] }
 0x1f3   : > { %1685 = vperm.xlu2 %2842, %v2712_v19   ;;  %1680 = vperm.xlu1 %2841, %v2711_v22   ;;  %v886_v5 = vadd.f32 %v858_v47, %v655_v42  ;;  %v1118_v19 = vadd.f32 %v1090_v2, %v887_v35  ;;  %v641_v26 = vadd.f32 %v613_v11, %v382_v59  ;;  %v4711_v35 = vld [vmem:[#allocation32_spill] sm:$0xff] }
 0x1f4   : > { %1675 = vperm.xlu0 %2840, %v2710_v25   ;;  %v1331_v22 = vadd.f32 %v1303_v16, %v1100_v6  ;;  %v833_v10 = vmul.f32 %v3594_v37, %v3388_v17  ;;  %v1065_v46 = vmul.f32 %v3603_v54, %v3444_v33  ;;  %v1075_v14 = vmul.f32 %v3603_v54, %v3511_v49  ;;  %v4709_v16 = vld [vmem:[#allocation58_spill] sm:$0xff] }
 0x1f5   : > { %v1430_v0 = vpop.permute.xlu2 %1429  ;;  %v1289_v12 = vpop.permute.xlu1 %1288  ;;  %v1117_v51 = vadd.f32 %v1089_v55, %v886_v5  ;;  %v630_v2 = vadd.f32 %v602_v62, %v3728_v52  ;;  %v606_v17 = vmul.f32 %v3577_v29, %v4709_v16  ;;  %v1064_v21 = vmul.f32 %v3603_v54, %v3473_v44  ;;  %v2713_v33 = vld [vmem:[%s2926_s19 + $0x98] sm:$0xff]  ;;  %v4710_v44 = vld [vmem:[#allocation24_spill] sm:$0xff] }
 0x1f6   : > { %v1534_v9 = vmul.f32 %v3656_v61, %v1430_v0  ;;  %v1321_v8 = vmul.f32 %v3613_v27, %v1289_v12  ;;  %v1284_v45 = vpop.permute.xlu0 %1283  ;;  %v872_v42 = vadd.f32 %v844_v30, %v641_v26  ;;  %v862_v55 = vadd.f32 %v834_v7, %v631_v31  ;;  %v4715_v16 = vld [vmem:[#allocation88_spill] sm:$0xff] }
 0x1f7   : > { %v1320_v15 = vmul.f32 %v3613_v27, %v1284_v45  ;;  %v1296_v49 = vmul.f32 %v3613_v27, %v3561_v41  ;;  %v1306_v40 = vmul.f32 %v3613_v27, %v3616_v39  ;;  %v616_v52 = vmul.f32 %v3577_v29, %v3341_v56  ;;  %v4712_v45 = vld [vmem:[#allocation84_spill] sm:$0xff] }
 0x1f8   : > { %v3804_v47 = vadd.f32 %v1534_v9, %v1331_v22  ;;  %v3806_v25 = vadd.f32 %v1321_v8, %v1118_v19  ;;  %v861_v59 = vadd.f32 %v833_v10, %v630_v2  ;;  %v1295_v50 = vmul.f32 %v3613_v27, %v3525_v32  ;;  %v4713_v10 = vld [vmem:[#allocation94_spill] sm:$0xff]  ;;  %v4714_v2 = vld [vmem:[#allocation63_spill] sm:$0xff] }
 0x1f9   : > { %v3815_v11 = vadd.f32 %v1320_v15, %v1117_v51  ;;  %v385_v62 = vmul.f32 %v3587_v60, %v4710_v44  ;;  %v605_v6 = vmul.f32 %v3577_v29, %v4711_v35  ;;  %v1093_v31 = vadd.f32 %v1065_v46, %v862_v55  ;;  %v4718_v44 = vld [vmem:[#allocation25_spill] sm:$0xff]  ;;  %v4719_v35 = vld [vmem:[#allocation28_spill] sm:$0xff] }
 0x1fa   : > { %v1103_v41 = vadd.f32 %v1075_v14, %v872_v42  ;;  %v634_v39 = vadd.f32 %v606_v17, %v3694_v57  ;;  %v847_v56 = vmul.f32 %v3594_v37, %v3393_v13  ;;  %v837_v30 = vmul.f32 %v3594_v37, %v3395_v18  ;;  %v2718_v14 = vld [vmem:[%s2926_s19 + $0xc0] sm:$0xff] }
 0x1fb   : > { %1700 = vperm.xlu2 %2842, %v2715_v63   ;;  %1695 = vperm.xlu1 %2841, %v2714_v3   ;;  %v1092_v32 = vadd.f32 %v1064_v21, %v861_v59  ;;  %v1324_v0 = vadd.f32 %v1296_v49, %v1093_v31  ;;  %v644_v57 = vadd.f32 %v616_v52, %v385_v62  ;;  %v2717_v63 = vld [vmem:[%s2926_s19 + $0xb8] sm:$0xff]  ;;  %v4716_v49 = vld [vmem:[#allocation43_spill] sm:$0xff]  ;;  %v4717_v59 = vld [vmem:[#allocation68_spill] sm:$0xff] }
 0x1fc   : > { %1690 = vperm.xlu0 %2840, %v2713_v33   ;;  %v1334_v12 = vadd.f32 %v1306_v40, %v1103_v41  ;;  %v836_v13 = vmul.f32 %v3594_v37, %v3397_v20  ;;  %v1068_v26 = vmul.f32 %v3603_v54, %v4712_v45  ;;  %v1078_v51 = vmul.f32 %v3603_v54, %v4713_v10  ;;  %v2716_v33 = vld [vmem:[%s2926_s19 + $0xb0] sm:$0xff]  ;;  %v4720_v31 = vld [vmem:[#allocation38_spill] sm:$0xff] }
 0x1fd   : > { %v1445_v7 = vpop.permute.xlu2 %1444  ;;  %v1395_v5 = vpop.permute.xlu1 %1394  ;;  %v1323_v8 = vadd.f32 %v1295_v50, %v1092_v32  ;;  %v633_v3 = vadd.f32 %v605_v6, %v3690_v53  ;;  %v609_v20 = vmul.f32 %v3577_v29, %v4714_v2  ;;  %v1067_v17 = vmul.f32 %v3603_v54, %v4715_v16  ;;  %v2721_v16 = vld [vmem:[%s2926_s19 + $0xd8] sm:$0xff] }
 0x1fe   : > { %v1537_v19 = vmul.f32 %v3656_v61, %v1445_v7  ;;  %v1527_v22 = vmul.f32 %v3656_v61, %v1395_v5  ;;  %v1390_v9 = vpop.permute.xlu0 %1389  ;;  %v875_v42 = vadd.f32 %v847_v56, %v644_v57  ;;  %v865_v55 = vadd.f32 %v837_v30, %v634_v39  ;;  %v4721_v30 = vld [vmem:[#allocation71_spill] sm:$0xff]  ;;  %v4722_v7 = vld [vmem:[#allocation72_spill] sm:$0xff] }
 0x1ff   : > { %v1526_v18 = vmul.f32 %v3656_v61, %v1390_v9  ;;  %v1299_v40 = vmul.f32 %v3613_v27, %v4716_v49  ;;  %v1309_v52 = vmul.f32 %v3613_v27, %v3635_v43  ;;  %v619_v53 = vmul.f32 %v3577_v29, %v4717_v59 }
 0x200   : > { %v3844_v15 = vadd.f32 %v1537_v19, %v1334_v12  ;;  %v3846_v46 = vadd.f32 %v1527_v22, %v1324_v0  ;;  %v864_v50 = vadd.f32 %v836_v13, %v633_v3  ;;  %v1298_v62 = vmul.f32 %v3613_v27, %v4718_v44 }
 0x201   : > { %v3855_v21 = vadd.f32 %v1526_v18, %v1323_v8  ;;  %v388_v6 = vmul.f32 %v3587_v60, %v4719_v35  ;;  %v608_v41 = vmul.f32 %v3577_v29, %v4720_v31  ;;  %v1096_v39 = vadd.f32 %v1068_v26, %v865_v55  ;;  %v4723_v18 = vld [vmem:[#allocation73_spill] sm:$0xff]  ;;  %v4728_v35 = vld [vmem:[#allocation36_spill] sm:$0xff] }
 0x202   : > { %v1106_v56 = vadd.f32 %v1078_v51, %v875_v42  ;;  %v637_v43 = vadd.f32 %v609_v20, %v3708_v24  ;;  %v850_v32 = vmul.f32 %v3594_v37, %v4721_v30  ;;  %v840_v5 = vmul.f32 %v3594_v37, %v4722_v7  ;;  %v4724_v51 = vld [vmem:[#allocation85_spill] sm:$0xff]  ;;  %v4726_v42 = vld [vmem:[#allocation90_spill] sm:$0xff]  ;;  %v4731_v30 = vld [vmem:[#allocation44_spill] sm:$0xff] }
 0x203   : > { %1715 = vperm.xlu2 %2842, %v2718_v14   ;;  %1710 = vperm.xlu1 %2841, %v2717_v63   ;;  %v1095_v0 = vadd.f32 %v1067_v17, %v864_v50  ;;  %v1327_v22 = vadd.f32 %v1299_v40, %v1096_v39  ;;  %v647_v24 = vadd.f32 %v619_v53, %v388_v6  ;;  %v4725_v63 = vld [vmem:[#allocation31_spill] sm:$0xff]  ;;  %v2720_v17 = vld [vmem:[%s2926_s19 + $0xd0] sm:$0xff]  ;;  %v2719_v40 = vld [vmem:[%s2926_s19 + $0xc8] sm:$0xff] }
 0x204   : > { %1705 = vperm.xlu0 %2840, %v2716_v33   ;;  %v1337_v9 = vadd.f32 %v1309_v52, %v1106_v56  ;;  %v839_v45 = vmul.f32 %v3594_v37, %v4723_v18  ;;  %v1071_v14 = vmul.f32 %v3603_v54, %v4724_v51  ;;  %v1081_v3 = vmul.f32 %v3603_v54, %v4725_v63  ;;  %v4727_v53 = vld [vmem:[#allocation48_spill] sm:$0xff]  ;;  %v4730_v56 = vld [vmem:[#allocation6_spill] sm:$0xff]  ;;  %v4732_v7 = vld [vmem:[#allocation75_spill] sm:$0xff] }
 0x205   : > { %v1460_v12 = vpop.permute.xlu2 %1459  ;;  %v1410_v19 = vpop.permute.xlu1 %1409  ;;  %v1326_v26 = vadd.f32 %v1298_v62, %v1095_v0  ;;  %v636_v33 = vadd.f32 %v608_v41, %v3745_v36  ;;  %v1070_v55 = vmul.f32 %v3603_v54, %v4726_v42  ;;  %v878_v52 = vadd.f32 %v850_v32, %v647_v24  ;;  %v4729_v36 = vld [vmem:[#allocation66_spill] sm:$0xff]  ;;  %v4734_v18 = vld [vmem:[#allocation76_spill] sm:$0xff] }
 0x206   : > { %v1540_v57 = vmul.f32 %v3656_v61, %v1460_v12  ;;  %v1530_v13 = vmul.f32 %v3656_v61, %v1410_v19  ;;  %v1405_v8 = vpop.permute.xlu0 %1404  ;;  %v868_v59 = vadd.f32 %v840_v5, %v637_v43  ;;  %v1302_v50 = vmul.f32 %v3613_v27, %v4727_v53  ;;  %v4736_v42 = vld [vmem:[#allocation92_spill] sm:$0xff] }
 0x207   : > { %v1529_v10 = vmul.f32 %v3656_v61, %v1405_v8  ;;  %v1312_v44 = vmul.f32 %v3613_v27, %v3662_v38  ;;  %v867_v62 = vadd.f32 %v839_v45, %v636_v33  ;;  %v1301_v6 = vmul.f32 %v3613_v27, %v4728_v35  ;;  %v4733_v8 = vld [vmem:[#allocation16_spill] sm:$0xff]  ;;  %v4739_v35 = vld [vmem:[#allocation67_spill] sm:$0xff] }
 0x208   : > { %v3884_v2 = vadd.f32 %v1540_v57, %v1337_v9  ;;  %v3886_v20 = vadd.f32 %v1530_v13, %v1327_v22  ;;  %v612_v31 = vmul.f32 %v3577_v29, %v4729_v36  ;;  %v1099_v41 = vadd.f32 %v1071_v14, %v868_v59  ;;  %v4735_v14 = vld [vmem:[#allocation86_spill] sm:$0xff] }
 0x209   : > { %v3893_v49 = vadd.f32 %v1529_v10, %v1326_v26  ;;  %v1109_v39 = vadd.f32 %v1081_v3, %v878_v52  ;;  %v381_v43 = vmul.f32 %v3587_v60, %v4730_v56  ;;  %v611_v32 = vmul.f32 %v3577_v29, %v4731_v30  ;;  %v4742_v56 = vld [vmem:[#allocation50_spill] sm:$0xff] }
 0x20a   : > { %v843_v38 = vmul.f32 %v3594_v37, %v4732_v7  ;;  %v1098_v5 = vadd.f32 %v1070_v55, %v867_v62  ;;  %v1330_v19 = vadd.f32 %v1302_v50, %v1099_v41  ;;  %v380_v24 = vmul.f32 %v3587_v60, %v4733_v8  ;;  %v4737_v50 = vld [vmem:[#allocation37_spill] sm:$0xff]  ;;  %v4743_v7 = vld [vmem:[#allocation78_spill] sm:$0xff] }
 0x20b   : > { %1730 = vperm.xlu2 %2842, %v2721_v16   ;;  %1725 = vperm.xlu1 %2841, %v2720_v17   ;;  %v1340_v22 = vadd.f32 %v1312_v44, %v1109_v39  ;;  %v842_v45 = vmul.f32 %v3594_v37, %v4734_v18  ;;  %v640_v51 = vadd.f32 %v612_v31, %v381_v43  ;;  %v2724_v17 = vld [vmem:[%s2926_s19 + $0xf0] sm:$0xff]  ;;  %v4740_v31 = vld [vmem:[#allocation74_spill] sm:$0xff] }
 0x20c   : > { %1720 = vperm.xlu0 %2840, %v2719_v40   ;;  %v1329_v26 = vadd.f32 %v1301_v6, %v1098_v5  ;;  %v1074_v63 = vmul.f32 %v3603_v54, %v4735_v14  ;;  %v639_v33 = vadd.f32 %v611_v32, %v380_v24  ;;  %v1073_v55 = vmul.f32 %v3603_v54, %v4736_v42  ;;  %v4738_v62 = vld [vmem:[#allocation77_spill] sm:$0xff] }
 0x20d   : > { %v1475_v0 = vpop.permute.xlu2 %1474  ;;  %v1425_v12 = vpop.permute.xlu1 %1424  ;;  %v871_v52 = vadd.f32 %v843_v38, %v640_v51  ;;  %v1305_v59 = vmul.f32 %v3613_v27, %v3621_v34  ;;  %v1304_v44 = vmul.f32 %v3613_v27, %v4737_v50  ;;  %v615_v6 = vmul.f32 %v3577_v29, %v4739_v35  ;;  %v4741_v41 = vld [vmem:[#allocation9_spill] sm:$0xff] }
 0x20e   : > { %v1543_v9 = vmul.f32 %v3656_v61, %v1475_v0  ;;  %v1533_v57 = vmul.f32 %v3656_v61, %v1425_v12  ;;  %v1420_v13 = vpop.permute.xlu0 %1419  ;;  %v870_v53 = vadd.f32 %v842_v45, %v639_v33  ;;  %v384_v39 = vmul.f32 %v3587_v60, %v4741_v41  ;;  %v4746_v45 = vld [vmem:[#allocation87_spill] sm:$0xff]  ;;  %v2728_v14 = vld [vmem:[%s2926_s19 + $0x29] sm:$0xff] }
 0x20f   : > { %v1532_v10 = vmul.f32 %v3656_v61, %v1420_v13  ;;  %v1102_v36 = vadd.f32 %v1074_v63, %v871_v52  ;;  %v614_v43 = vmul.f32 %v3577_v29, %v4742_v56  ;;  %v846_v38 = vmul.f32 %v3594_v37, %v4743_v7  ;;  %v2727_v63 = vld [vmem:[%s2926_s19 + $0x21] sm:$0xff]  ;;  %v4747_v33 = vld [vmem:[#allocation93_spill] sm:$0xff]  ;;  %v2725_v52 = vld [vmem:[%s2926_s19 + $0xf8] sm:$0xff] }
 0x210   : > { %v3919_v3 = vadd.f32 %v1543_v9, %v1340_v22  ;;  %v3921_v16 = vadd.f32 %v1533_v57, %v1330_v19  ;;  %v1101_v34 = vadd.f32 %v1073_v55, %v870_v53  ;;  %v4744_v22 = vld [vmem:[#allocation19_spill] sm:$0xff]  ;;  %v643_v18 = vadd.f32 %v615_v6, %v384_v39  ;;  %v4751_v41 = vld [vmem:[#allocation56_spill] sm:$0xff] }
 0x211   : > { %v3926_v40 = vadd.f32 %v1532_v10, %v1329_v26  ;;  %v1333_v5 = vadd.f32 %v1305_v59, %v1102_v36  ;;  %v383_v9 = vmul.f32 %v3587_v60, %v4744_v22  ;;  %v4745_v57 = vld [vmem:[#allocation79_spill] sm:$0xff]  ;;  %v1077_v26 = vmul.f32 %v3603_v54, %v4746_v45  ;;  %v4750_v36 = vld [vmem:[#allocation12_spill] sm:$0xff] }
 0x212   : > { %v845_v13 = vmul.f32 %v3594_v37, %v4745_v57  ;;  %v1332_v8 = vadd.f32 %v1304_v44, %v1101_v34  ;;  %v1076_v42 = vmul.f32 %v3603_v54, %v4747_v33  ;;  %v874_v59 = vadd.f32 %v846_v38, %v643_v18  ;;  %v4748_v44 = vld [vmem:[#allocation29_spill] sm:$0xff]  ;;  %v4752_v34 = vld [vmem:[#allocation80_spill] sm:$0xff] }
 0x213   : > { %1745 = vperm.xlu2 %2842, %v2724_v17   ;;  %1740 = vperm.xlu1 %2841, %v4738_v62   ;;  %v642_v17 = vadd.f32 %v614_v43, %v383_v9  ;;  %v1308_v53 = vmul.f32 %v3613_v27, %v3642_v23  ;;  %v4749_v62 = vld [vmem:[#allocation69_spill] sm:$0xff]  ;;  %v617_v39 = vmul.f32 %v3577_v29, %v4751_v41 }
 0x214   : > { %1735 = vperm.xlu0 %2840, %v4740_v31   ;;  %v618_v35 = vmul.f32 %v3577_v29, %v4749_v62  ;;  %v1105_v6 = vadd.f32 %v1077_v26, %v874_v59  ;;  %v387_v31 = vmul.f32 %v3587_v60, %v4750_v36  ;;  %v2731_v26 = vld [vmem:[%s2926_s19 + $0x41] sm:$0xff] }
 0x215   : > { %v1490_v30 = vpop.permute.xlu2 %1489  ;;  %v1440_v32 = vpop.permute.xlu1 %1439  ;;  %v873_v50 = vadd.f32 %v845_v13, %v642_v17  ;;  %v4756_v17 = vld [vmem:[#allocation21_spill] sm:$0xff] }
 0x216   : > { %v1546_v0 = vmul.f32 %v3656_v61, %v1490_v30  ;;  %v1536_v12 = vmul.f32 %v3656_v61, %v1440_v32  ;;  %v1435_v19 = vpop.permute.xlu0 %1434  ;;  %v849_v30 = vmul.f32 %v3594_v37, %v4752_v34  ;;  %v1336_v32 = vadd.f32 %v1308_v53, %v1105_v6  ;;  %v4759_v6 = vld [vmem:[#allocation15_spill] sm:$0xff] }
 0x217   : > { %v1535_v24 = vmul.f32 %v3656_v61, %v1435_v19  ;;  %v1104_v56 = vadd.f32 %v1076_v42, %v873_v50  ;;  %v4754_v19 = vld [vmem:[#allocation81_spill] sm:$0xff]  ;;  %v646_v13 = vadd.f32 %v618_v35, %v387_v31  ;;  %v1079_v33 = vmul.f32 %v3603_v54, %v4756_v17 }
 0x218   : > { %v3952_v10 = vadd.f32 %v1546_v0, %v3720_v1  ;;  %v3954_v51 = vadd.f32 %v1536_v12, %v1333_v5  ;;  %v1307_v1 = vmul.f32 %v3613_v27, %v4748_v44  ;;  %v4753_v0 = vld [vmem:[#allocation23_spill] sm:$0xff]  ;;  %v848_v22 = vmul.f32 %v3594_v37, %v4754_v19  ;;  %v4757_v44 = vld [vmem:[#allocation42_spill] sm:$0xff]  ;;  %v4760_v31 = vld [vmem:[#allocation61_spill] sm:$0xff] }
 0x219   : > { %v3960_v55 = vadd.f32 %v1535_v24, %v1332_v8  ;;  %v386_v12 = vmul.f32 %v3587_v60, %v4753_v0  ;;  %v4755_v8 = vld [vmem:[#allocation89_spill] sm:$0xff]  ;;  %v877_v59 = vadd.f32 %v849_v30, %v646_v13  ;;  %v1311_v53 = vmul.f32 %v3613_v27, %v3669_v48  ;;  %v4763_v0 = vld [vmem:[#allocation83_spill] sm:$0xff] }
 0x21a   : > { %v1335_v9 = vadd.f32 %v1307_v1, %v1104_v56  ;;  %v1080_v24 = vmul.f32 %v3603_v54, %v4755_v8  ;;  %v4758_v1 = vld [vmem:[#allocation70_spill] sm:$0xff]  ;;  %v390_v36 = vmul.f32 %v3587_v60, %v4759_v6  ;;  %v620_v41 = vmul.f32 %v3577_v29, %v4760_v31 }
 0x21b   : > { %1851 = vperm.xlu2 %2842, %v2728_v14   ;;  %1846 = vperm.xlu1 %2841, %v2727_v63   ;;  %v2730_v14 = vld [vmem:[%s2926_s19 + $0x39] sm:$0xff]  ;;  %v645_v63 = vadd.f32 %v617_v39, %v386_v12  ;;  %v621_v62 = vmul.f32 %v3577_v29, %v4758_v1  ;;  %v851_v29 = vmul.f32 %v3594_v37, %v4763_v0 }
 0x21c   : > { %1750 = vperm.xlu0 %2840, %v2725_v52   ;;  %v2729_v52 = vld [vmem:[%s2926_s19 + $0x31] sm:$0xff]  ;;  %v1108_v35 = vadd.f32 %v1080_v24, %v877_v59  ;;  %v2734_v24 = vld [vmem:[%s2926_s19 + $0x59] sm:$0xff] }
 0x21d   : > { %v1505_v23 = vpop.permute.xlu2 %1504  ;;  %v1455_v43 = vpop.permute.xlu1 %1454  ;;  %v876_v50 = vadd.f32 %v848_v22, %v645_v63  ;;  %v649_v22 = vadd.f32 %v621_v62, %v390_v36  ;;  %v4765_v63 = vld [vmem:[#allocation30_spill] sm:$0xff] }
 0x21e   : > { %v1549_v7 = vmul.f32 %v3656_v61, %v1505_v23  ;;  %v1539_v38 = vmul.f32 %v3656_v61, %v1455_v43  ;;  %v1450_v5 = vpop.permute.xlu0 %1449  ;;  %v4761_v23 = vld [vmem:[#allocation82_spill] sm:$0xff]  ;;  %v1339_v34 = vadd.f32 %v1311_v53, %v1108_v35 }
 0x21f   : > { %v1538_v57 = vmul.f32 %v3656_v61, %v1450_v5  ;;  %v1107_v39 = vadd.f32 %v1079_v33, %v876_v50  ;;  %v852_v43 = vmul.f32 %v3594_v37, %v4761_v23  ;;  %v2732_v37 = vld [vmem:[%s2926_s19 + $0x49] sm:$0xff]  ;;  %v4767_v50 = vld [vmem:[#allocation35_spill] sm:$0xff] }
 0x220   : > { %v3985_v18 = vadd.f32 %v1549_v7, %v3766_v4  ;;  %v3987_v45 = vadd.f32 %v1539_v38, %v1336_v32  ;;  %v1310_v4 = vmul.f32 %v3613_v27, %v4757_v44  ;;  %v4762_v38 = vld [vmem:[#allocation27_spill] sm:$0xff]  ;;  %v1313_v44 = vmul.f32 %v3613_v27, %v4767_v50  ;;  %v2736_v23 = vld [vmem:[%s2926_s19 + $0x69] sm:$0xff]  ;;  %v2741_v50 = vld [vmem:[%s2926_s19 + $0x91] sm:$0xff] }
 0x221   : > { %v3993_v42 = vadd.f32 %v1538_v57, %v1335_v9  ;;  %v389_v5 = vmul.f32 %v3587_v60, %v4762_v38  ;;  %v4764_v9 = vld [vmem:[#allocation91_spill] sm:$0xff]  ;;  %v1082_v60 = vmul.f32 %v3603_v54, %v4765_v63  ;;  %v880_v33 = vadd.f32 %v852_v43, %v649_v22  ;;  %v4768_v22 = vld [vmem:[#allocation49_spill] sm:$0xff] }
 0x222   : > { %v1338_v12 = vadd.f32 %v1310_v4, %v1107_v39  ;;  %v1083_v57 = vmul.f32 %v3603_v54, %v4764_v9 }
 0x223   : > { %1866 = vperm.xlu2 %2842, %v2731_v26   ;;  %1861 = vperm.xlu1 %2841, %v2730_v14   ;;  %v2733_v26 = vld [vmem:[%s2926_s19 + $0x51] sm:$0xff]  ;;  %v648_v14 = vadd.f32 %v620_v41, %v389_v5 }
 0x224   : > { %1856 = vperm.xlu0 %2840, %v2729_v52   ;;  %v4766_v52 = vld [vmem:[#allocation55_spill] sm:$0xff]  ;;  %v1111_v54 = vadd.f32 %v1083_v57, %v880_v33 }
 0x225   : > { %v1520_v48 = vpop.permute.xlu2 %1519  ;;  %v1470_v56 = vpop.permute.xlu1 %1469  ;;  %v1314_v59 = vmul.f32 %v3613_v27, %v4766_v52  ;;  %v879_v53 = vadd.f32 %v851_v29, %v648_v14  ;;  %v2738_v57 = vld [vmem:[%s2926_s19 + $0x79] sm:$0xff]  ;;  %v2743_v33 = vld [vmem:[%s2926_s19 + $0xa1] sm:$0xff] }
 0x226   : > { %v1552_v30 = vmul.f32 %v3656_v61, %v1520_v48  ;;  %v1542_v32 = vmul.f32 %v3656_v61, %v1470_v56  ;;  %v1465_v7 = vpop.permute.xlu0 %1464  ;;  %v2737_v56 = vld [vmem:[%s2926_s19 + $0x71] sm:$0xff]  ;;  %v2742_v52 = vld [vmem:[%s2926_s19 + $0x99] sm:$0xff] }
 0x227   : > { %v1541_v19 = vmul.f32 %v3656_v61, %v1465_v7  ;;  %v1110_v4 = vadd.f32 %v1082_v60, %v879_v53  ;;  %v1342_v35 = vadd.f32 %v1314_v59, %v1111_v54  ;;  %v4769_v59 = vld [vmem:[#allocation41_spill] sm:$0xff] }
 0x228   : > { %v4018_v13 = vadd.f32 %v1552_v30, %v3806_v25  ;;  %v4020_v8 = vadd.f32 %v1542_v32, %v1339_v34  ;;  %v4034_v25 = vld [vmem:[%s4531_s1 + $0x6] ss:$0 sm:$0xff] }
 0x229   : > { %v4026_v17 = vadd.f32 %v1541_v19, %v1338_v12  ;;  %v1341_v41 = vadd.f32 %v1313_v44, %v1110_v4  ;;  %v2735_v34 = vld [vmem:[%s2926_s19 + $0x61] sm:$0xff]  ;;  %v2740_v12 = vld [vmem:[%s2926_s19 + $0x89] sm:$0xff] }
 0x22a   : > { %v2739_v19 = vld [vmem:[%s2926_s19 + $0x81] sm:$0xff] }
 0x22b   : > { %1881 = vperm.xlu2 %2842, %v2734_v24   ;;  %1876 = vperm.xlu1 %2841, %v2733_v26  }
 0x22c   : > { %1871 = vperm.xlu0 %2840, %v2732_v37  }
 0x22d   : > { %v1626_v1 = vpop.permute.xlu2 %1625  ;;  %v1485_v62 = vpop.permute.xlu1 %1484 }
 0x22e   : > { %v1758_v6 = vmul.f32 %v4034_v25, %v1626_v1  ;;  %v1545_v36 = vmul.f32 %v3656_v61, %v1485_v62  ;;  %v1480_v31 = vpop.permute.xlu0 %1479 }
 0x22f   : > { %v1544_v39 = vmul.f32 %v3656_v61, %v1480_v31 }
 0x230   : > { %v4042_v27 = vadd.f32 %v1758_v6, %v3846_v46  ;;  %v4044_v48 = vadd.f32 %v1545_v36, %v1342_v35  ;;  %v2746_v35 = vld [vmem:[%s2926_s19 + $0xb9] sm:$0xff]  ;;  %v2745_v6 = vld [vmem:[%s2926_s19 + $0xb1] sm:$0xff] }
 0x231   : > { %v4048_v43 = vadd.f32 %v1544_v39, %v1341_v41  ;;  %v4770_v36 = vld [vmem:[#allocation54_spill] sm:$0xff]  ;;  %v2744_v41 = vld [vmem:[%s2926_s19 + $0xa9] sm:$0xff] }
 0x233   : > { %1896 = vperm.xlu2 %2842, %v2737_v56   ;;  %1891 = vperm.xlu1 %2841, %v2736_v23  }
 0x234   : > { %1886 = vperm.xlu0 %2840, %v2735_v34  }
 0x235   : > { %v1641_v30 = vpop.permute.xlu2 %1640  ;;  %v1500_v32 = vpop.permute.xlu1 %1499 }
 0x236   : > { %v1761_v7 = vmul.f32 %v4034_v25, %v1641_v30  ;;  %v1548_v46 = vmul.f32 %v3656_v61, %v1500_v32  ;;  %v1495_v38 = vpop.permute.xlu0 %1494 }
 0x237   : > { %v1547_v5 = vmul.f32 %v3656_v61, %v1495_v38  ;;  %v4771_v38 = vld [vmem:[#allocation47_spill] sm:$0xff] }
 0x238   : > { %v4055_v0 = vadd.f32 %v1761_v7, %v3886_v20  ;;  %v4058_v29 = vadd.f32 %v1548_v46, %v3776_v58  ;;  %v2749_v7 = vld [vmem:[%s2926_s19 + $0xd1] sm:$0xff]  ;;  %v2748_v46 = vld [vmem:[%s2926_s19 + $0xc9] sm:$0xff] }
 0x239   : > { %v4063_v9 = vadd.f32 %v1547_v5, %v4768_v22 }
 0x23b   : > { %1911 = vperm.xlu2 %2842, %v2740_v12   ;;  %1906 = vperm.xlu1 %2841, %v2739_v19   ;;  %v2747_v12 = vld [vmem:[%s2926_s19 + $0xc1] sm:$0xff] }
 0x23c   : > { %1901 = vperm.xlu0 %2840, %v2738_v57  }
 0x23d   : > { %v1656_v24 = vpop.permute.xlu2 %1655  ;;  %v1515_v26 = vpop.permute.xlu1 %1514 }
 0x23e   : > { %v1764_v20 = vmul.f32 %v4034_v25, %v1656_v24  ;;  %v1551_v14 = vmul.f32 %v3656_v61, %v1515_v26  ;;  %v1510_v58 = vpop.permute.xlu0 %1509 }
 0x23f   : > { %v1550_v63 = vmul.f32 %v3656_v61, %v1510_v58  ;;  %v2750_v58 = vld [vmem:[%s2926_s19 + $0xd9] sm:$0xff] }
 0x240   : > { %v4070_v60 = vadd.f32 %v1764_v20, %v3921_v16  ;;  %v4073_v37 = vadd.f32 %v1551_v14, %v3815_v11 }
 0x241   : > { %v4078_v53 = vadd.f32 %v1550_v63, %v4769_v59  ;;  %v2853_v63 = vld [vmem:[%s2926_s19 + $0xe9] sm:$0xff] }
 0x243   : > { %1926 = vperm.xlu2 %2842, %v2743_v33   ;;  %1921 = vperm.xlu1 %2841, %v2742_v52   ;;  %v2854_v33 = vld [vmem:[%s2926_s19 + $0xe1] sm:$0xff] }
 0x244   : > { %1916 = vperm.xlu0 %2840, %v2741_v50  }
 0x245   : > { %v1671_v44 = vpop.permute.xlu2 %1670  ;;  %v1621_v61 = vpop.permute.xlu1 %1620 }
 0x246   : > { %v1767_v16 = vmul.f32 %v4034_v25, %v1671_v44  ;;  %v1757_v54 = vmul.f32 %v4034_v25, %v1621_v61  ;;  %v1616_v11 = vpop.permute.xlu0 %1615 }
 0x247   : > { %v1756_v4 = vmul.f32 %v4034_v25, %v1616_v11 }
 0x248   : > { %v4085_v1 = vadd.f32 %v1767_v16, %v3954_v51  ;;  %v4088_v62 = vadd.f32 %v1757_v54, %v3855_v21  ;;  %v2756_v16 = vld [vmem:[%s2926_s19 + $0x22] sm:$0xff]  ;;  %v2754_v54 = vld [vmem:[%s2926_s19 + $0xf9] sm:$0xff] }
 0x249   : > { %v4093_v31 = vadd.f32 %v1756_v4, %v4770_v36  ;;  %v2753_v4 = vld [vmem:[%s2926_s19 + $0xf1] sm:$0xff] }
 0x24b   : > { %1941 = vperm.xlu2 %2842, %v2746_v35   ;;  %1936 = vperm.xlu1 %2841, %v2745_v6  }
 0x24c   : > { %1931 = vperm.xlu0 %2840, %v2744_v41  }
 0x24d   : > { %v1686_v39 = vpop.permute.xlu2 %1685  ;;  %v1636_v56 = vpop.permute.xlu1 %1635 }
 0x24e   : > { %v1770_v51 = vmul.f32 %v4034_v25, %v1686_v39  ;;  %v1760_v23 = vmul.f32 %v4034_v25, %v1636_v56  ;;  %v1631_v21 = vpop.permute.xlu0 %1630  ;;  %v2759_v56 = vld [vmem:[%s2926_s19 + $0x3a] sm:$0xff] }
 0x24f   : > { %v1759_v34 = vmul.f32 %v4034_v25, %v1631_v21  ;;  %v2757_v21 = vld [vmem:[%s2926_s19 + $0x2a] sm:$0xff] }
 0x250   : > { %v4100_v30 = vadd.f32 %v1770_v51, %v3987_v45  ;;  %v4103_v32 = vadd.f32 %v1760_v23, %v3893_v49  ;;  %v2758_v51 = vld [vmem:[%s2926_s19 + $0x32] sm:$0xff] }
 0x251   : > { %v4108_v5 = vadd.f32 %v1759_v34, %v4771_v38 }
 0x253   : > { %1956 = vperm.xlu2 %2842, %v2749_v7   ;;  %1951 = vperm.xlu1 %2841, %v2748_v46  }
 0x254   : > { %1946 = vperm.xlu0 %2840, %v2747_v12  }
 0x255   : > { %v1701_v19 = vpop.permute.xlu2 %1700  ;;  %v1651_v22 = vpop.permute.xlu1 %1650 }
 0x256   : > { %v1773_v45 = vmul.f32 %v4034_v25, %v1701_v19  ;;  %v1763_v57 = vmul.f32 %v4034_v25, %v1651_v22  ;;  %v1646_v49 = vpop.permute.xlu0 %1645  ;;  %v2762_v19 = vld [vmem:[%s2926_s19 + $0x52] sm:$0xff]  ;;  %v2761_v22 = vld [vmem:[%s2926_s19 + $0x4a] sm:$0xff] }
 0x257   : > { %v1762_v24 = vmul.f32 %v4034_v25, %v1646_v49  ;;  %v4174_v49 = vld [vmem:[%s4531_s1 + $0x7] ss:$0 sm:$0xff] }
 0x258   : > { %v4115_v26 = vadd.f32 %v1773_v45, %v4020_v8  ;;  %v4118_v20 = vadd.f32 %v1763_v57, %v3926_v40  ;;  %v2760_v57 = vld [vmem:[%s2926_s19 + $0x42] sm:$0xff] }
 0x259   : > { %v4121_v14 = vadd.f32 %v1762_v24, %v3764_v28 }
 0x25b   : > { %1971 = vperm.xlu2 %2842, %v2853_v63   ;;  %1966 = vperm.xlu1 %2841, %v2854_v33  }
 0x25c   : > { %1961 = vperm.xlu0 %2840, %v2750_v58  }
 0x25d   : > { %v1716_v52 = vpop.permute.xlu2 %1715  ;;  %v1666_v59 = vpop.permute.xlu1 %1665 }
 0x25e   : > { %v1776_v8 = vmul.f32 %v4034_v25, %v1716_v52  ;;  %v1766_v50 = vmul.f32 %v4034_v25, %v1666_v59  ;;  %v1661_v40 = vpop.permute.xlu0 %1660  ;;  %v2765_v59 = vld [vmem:[%s2926_s19 + $0x6a] sm:$0xff] }
 0x25f   : > { %v1765_v44 = vmul.f32 %v4034_v25, %v1661_v40  ;;  %v2763_v40 = vld [vmem:[%s2926_s19 + $0x5a] sm:$0xff] }
 0x260   : > { %v4130_v28 = vadd.f32 %v1776_v8, %v4044_v48  ;;  %v4133_v61 = vadd.f32 %v1766_v50, %v3960_v55  ;;  %v2764_v8 = vld [vmem:[%s2926_s19 + $0x62] sm:$0xff] }
 0x261   : > { %v4138_v11 = vadd.f32 %v1765_v44, %v3804_v47 }
 0x263   : > { %2077 = vperm.xlu2 %2842, %v2756_v16   ;;  %1981 = vperm.xlu1 %2841, %v2754_v54  }
 0x264   : > { %1976 = vperm.xlu0 %2840, %v2753_v4  }
 0x265   : > { %v1731_v35 = vpop.permute.xlu2 %1730  ;;  %v1681_v6 = vpop.permute.xlu1 %1680 }
 0x266   : > { %v1779_v48 = vmul.f32 %v4034_v25, %v1731_v35  ;;  %v1769_v36 = vmul.f32 %v4034_v25, %v1681_v6  ;;  %v1676_v55 = vpop.permute.xlu0 %1675  ;;  %v2768_v6 = vld [vmem:[%s2926_s19 + $0x82] sm:$0xff] }
 0x267   : > { %v1768_v41 = vmul.f32 %v4034_v25, %v1676_v55  ;;  %v2766_v55 = vld [vmem:[%s2926_s19 + $0x72] sm:$0xff] }
 0x268   : > { %v4145_v39 = vadd.f32 %v1779_v48, %v4058_v29  ;;  %v4148_v47 = vadd.f32 %v1769_v36, %v3993_v42  ;;  %v2767_v48 = vld [vmem:[%s2926_s19 + $0x7a] sm:$0xff] }
 0x269   : > { %v4153_v23 = vadd.f32 %v1768_v41, %v3844_v15 }
 0x26b   : > { %2092 = vperm.xlu2 %2842, %v2759_v56   ;;  %2087 = vperm.xlu1 %2841, %v2758_v51  }
 0x26c   : > { %2082 = vperm.xlu0 %2840, %v2757_v21  }
 0x26d   : > { %v1746_v34 = vpop.permute.xlu2 %1745  ;;  %v1696_v7 = vpop.permute.xlu1 %1695 }
 0x26e   : > { %v1782_v29 = vmul.f32 %v4034_v25, %v1746_v34  ;;  %v1772_v46 = vmul.f32 %v4034_v25, %v1696_v7  ;;  %v1691_v42 = vpop.permute.xlu0 %1690  ;;  %v2771_v7 = vld [vmem:[%s2926_s19 + $0x9a] sm:$0xff] }
 0x26f   : > { %v1771_v38 = vmul.f32 %v4034_v25, %v1691_v42  ;;  %v2769_v42 = vld [vmem:[%s2926_s19 + $0x8a] sm:$0xff] }
 0x270   : > { %v4160_v12 = vadd.f32 %v1782_v29, %v4073_v37  ;;  %v4163_v15 = vadd.f32 %v1772_v46, %v4026_v17  ;;  %v2770_v29 = vld [vmem:[%s2926_s19 + $0x92] sm:$0xff] }
 0x271   : > { %v4168_v45 = vadd.f32 %v1771_v38, %v3884_v2 }
 0x273   : > { %2107 = vperm.xlu2 %2842, %v2762_v19   ;;  %2102 = vperm.xlu1 %2841, %v2761_v22  }
 0x274   : > { %2097 = vperm.xlu0 %2840, %v2760_v57  }
 0x275   : > { %v1852_v37 = vpop.permute.xlu2 %1851  ;;  %v1711_v17 = vpop.permute.xlu1 %1710 }
 0x276   : > { %v1988_v24 = vmul.f32 %v4174_v49, %v1852_v37  ;;  %v1775_v58 = vmul.f32 %v4034_v25, %v1711_v17  ;;  %v1706_v63 = vpop.permute.xlu0 %1705  ;;  %v2774_v37 = vld [vmem:[%s2926_s19 + $0xb2] sm:$0xff] }
 0x277   : > { %v1774_v2 = vmul.f32 %v4034_v25, %v1706_v63 }
 0x278   : > { %v4180_v33 = vadd.f32 %v1988_v24, %v4088_v62  ;;  %v4183_v52 = vadd.f32 %v1775_v58, %v4048_v43  ;;  %v2772_v24 = vld [vmem:[%s2926_s19 + $0xa2] sm:$0xff] }
 0x279   : > { %v4188_v50 = vadd.f32 %v1774_v2, %v3919_v3 }
 0x27b   : > { %2122 = vperm.xlu2 %2842, %v2765_v59   ;;  %2117 = vperm.xlu1 %2841, %v2764_v8   ;;  %v2777_v8 = vld [vmem:[%s2926_s19 + $0xca] sm:$0xff] }
 0x27c   : > { %2112 = vperm.xlu0 %2840, %v2763_v40  }
 0x27d   : > { %v1867_v44 = vpop.permute.xlu2 %1866  ;;  %v1726_v16 = vpop.permute.xlu1 %1725 }
 0x27e   : > { %v1991_v62 = vmul.f32 %v4174_v49, %v1867_v44  ;;  %v1778_v54 = vmul.f32 %v4034_v25, %v1726_v16  ;;  %v1721_v43 = vpop.permute.xlu0 %1720  ;;  %v2775_v44 = vld [vmem:[%s2926_s19 + $0xba] sm:$0xff] }
 0x27f   : > { %v1777_v4 = vmul.f32 %v4034_v25, %v1721_v43 }
 0x280   : > { %v4195_v35 = vadd.f32 %v1991_v62, %v4103_v32  ;;  %v4198_v3 = vadd.f32 %v1778_v54, %v4063_v9 }
 0x281   : > { %v4203_v36 = vadd.f32 %v1777_v4, %v3952_v10 }
 0x283   : > { %2137 = vperm.xlu2 %2842, %v2768_v6   ;;  %2132 = vperm.xlu1 %2841, %v2767_v48   ;;  %v2779_v6 = vld [vmem:[%s2926_s19 + $0xda] sm:$0xff]  ;;  %v2778_v48 = vld [vmem:[%s2926_s19 + $0xd2] sm:$0xff] }
 0x284   : > { %2127 = vperm.xlu0 %2840, %v2766_v55   ;;  %v2855_v55 = vld [vmem:[%s2926_s19 + $0xe2] sm:$0xff] }
 0x285   : > { %v1882_v41 = vpop.permute.xlu2 %1881  ;;  %v1741_v56 = vpop.permute.xlu1 %1740 }
 0x286   : > { %v1994_v32 = vmul.f32 %v4174_v49, %v1882_v41  ;;  %v1781_v51 = vmul.f32 %v4034_v25, %v1741_v56  ;;  %v1736_v9 = vpop.permute.xlu0 %1735 }
 0x287   : > { %v1780_v21 = vmul.f32 %v4034_v25, %v1736_v9 }
 0x288   : > { %v4210_v34 = vadd.f32 %v1994_v32, %v4118_v20  ;;  %v4213_v10 = vadd.f32 %v1781_v51, %v4078_v53 }
 0x289   : > { %v4218_v46 = vadd.f32 %v1780_v21, %v3985_v18  ;;  %v2773_v18 = vld [vmem:[%s2926_s19 + $0xaa] sm:$0xff]  ;;  %v2783_v21 = vld [vmem:[%s2926_s19 + $0xfa] sm:$0xff] }
 0x28b   : > { %2152 = vperm.xlu2 %2842, %v2771_v7   ;;  %2147 = vperm.xlu1 %2841, %v2770_v29   ;;  %v2856_v29 = vld [vmem:[%s2926_s19 + $0xea] sm:$0xff] }
 0x28c   : > { %2142 = vperm.xlu0 %2840, %v2769_v42  }
 0x28d   : > { %v1897_v38 = vpop.permute.xlu2 %1896  ;;  %v4221_v19 = vpop.permute.xlu1 %1846 }
 0x28e   : > { %v1997_v20 = vmul.f32 %v4174_v49, %v1897_v38  ;;  %v1751_v22 = vpop.permute.xlu0 %1750 }
 0x28f   : > { %v1783_v53 = vmul.f32 %v4034_v25, %v1751_v22 }
 0x290   : > { %v4226_v57 = vadd.f32 %v1997_v20, %v4133_v61 }
 0x291   : > { %v4231_v17 = vadd.f32 %v1783_v53, %v4018_v13  ;;  %v2776_v13 = vld [vmem:[%s2926_s19 + $0xc2] sm:$0xff] }
 0x293   : > { %2167 = vperm.xlu2 %2842, %v2774_v37   ;;  %2162 = vperm.xlu1 %2841, %v2773_v18  }
 0x294   : > { %2157 = vperm.xlu0 %2840, %v2772_v24  }
 0x295   : > { %v1912_v58 = vpop.permute.xlu2 %1911  ;;  %v4234_v63 = vpop.permute.xlu1 %1861 }
 0x296   : > { %v2000_v2 = vmul.f32 %v4174_v49, %v1912_v58  ;;  %v1857_v25 = vpop.permute.xlu0 %1856 }
 0x297   : > { %v1989_v61 = vmul.f32 %v4174_v49, %v1857_v25 }
 0x298   : > { %v4239_v59 = vadd.f32 %v2000_v2, %v4148_v47 }
 0x299   : > { %v4244_v40 = vadd.f32 %v1989_v61, %v4042_v27 }
 0x29b   : > { %2182 = vperm.xlu2 %2842, %v2777_v8   ;;  %2177 = vperm.xlu1 %2841, %v2776_v13  }
 0x29c   : > { %2172 = vperm.xlu0 %2840, %v2775_v44  }
 0x29d   : > { %v1927_v16 = vpop.permute.xlu2 %1926  ;;  %v4247_v62 = vpop.permute.xlu1 %1876 }
 0x29e   : > { %v2003_v54 = vmul.f32 %v4174_v49, %v1927_v16  ;;  %v1872_v43 = vpop.permute.xlu0 %1871 }
 0x29f   : > { %v1992_v47 = vmul.f32 %v4174_v49, %v1872_v43 }
 0x2a0   : > { %v4252_v4 = vadd.f32 %v2003_v54, %v4163_v15 }
 0x2a1   : > { %v4256_v27 = vadd.f32 %v1992_v47, %v4055_v0  ;;  %v2782_v0 = vld [vmem:[%s2926_s19 + $0xf2] sm:$0xff]  ;;  %v1990_v47 = vmul.f32 %v4174_v49, %v4234_v63 }
 0x2a3   : > { %2197 = vperm.xlu2 %2842, %v2855_v55   ;;  %2192 = vperm.xlu1 %2841, %v2779_v6  }
 0x2a4   : > { %2187 = vperm.xlu0 %2840, %v2778_v48  }
 0x2a5   : > { %v1942_v41 = vpop.permute.xlu2 %1941  ;;  %v4260_v56 = vpop.permute.xlu1 %1891 }
 0x2a6   : > { %v2006_v32 = vmul.f32 %v4174_v49, %v1942_v41  ;;  %v1887_v51 = vpop.permute.xlu0 %1886  ;;  %v2018_v41 = vadd.f32 %v1990_v47, %v4108_v5 }
 0x2a7   : > { %v1995_v9 = vmul.f32 %v4174_v49, %v1887_v51 }
 0x2a8   : > { %v4265_v15 = vadd.f32 %v2006_v32, %v4183_v52 }
 0x2a9   : > { %v4270_v7 = vadd.f32 %v1995_v9, %v4070_v60 }
 0x2ab   : > { %2212 = vperm.xlu2 %2842, %v2783_v21   ;;  %2207 = vperm.xlu1 %2841, %v2782_v0   ;;  %v1993_v21 = vmul.f32 %v4174_v49, %v4247_v62 }
 0x2ac   : > { %2202 = vperm.xlu0 %2840, %v2856_v29  }
 0x2ad   : > { %v1957_v42 = vpop.permute.xlu2 %1956  ;;  %v4273_v38 = vpop.permute.xlu1 %1906 }
 0x2ae   : > { %v2009_v20 = vmul.f32 %v4174_v49, %v1957_v42  ;;  %v1902_v22 = vpop.permute.xlu0 %1901  ;;  %v1999_v47 = vmul.f32 %v4174_v49, %v4273_v38 }
 0x2af   : > { %v1998_v53 = vmul.f32 %v4174_v49, %v1902_v22  ;;  %v2021_v22 = vadd.f32 %v1993_v21, %v4121_v14 }
 0x2b0   : > { %v4278_v52 = vadd.f32 %v2009_v20, %v4198_v3  ;;  %v1987_v3 = vmul.f32 %v4174_v49, %v4221_v19 }
 0x2b1   : > { %v4281_v37 = vadd.f32 %v1998_v53, %v4085_v1  ;;  %v4298_v1 = vld [vmem:[%s4531_s1 + $0x8] ss:$0 sm:$0xff] }
 0x2b2   : > { %v2015_v44 = vadd.f32 %v1987_v3, %v4093_v31 }
 0x2b5   : > { %v1972_v60 = vpop.permute.xlu2 %1971  ;;  %v4283_v18 = vpop.permute.xlu1 %1921 }
 0x2b6   : > { %v2012_v24 = vmul.f32 %v4174_v49, %v1972_v60  ;;  %v1917_v58 = vpop.permute.xlu0 %1916 }
 0x2b7   : > { %v2001_v2 = vmul.f32 %v4174_v49, %v1917_v58  ;;  %v1996_v58 = vmul.f32 %v4174_v49, %v4260_v56 }
 0x2b8   : > { %v4288_v25 = vadd.f32 %v2012_v24, %v4213_v10  ;;  %v4306_v10 = vld [vmem:[%s4532_s2] ss:$0 sm:$0xff] }
 0x2b9   : > { %v4291_v61 = vadd.f32 %v2001_v2, %v4100_v30 }
 0x2bd   : > { %v2078_v8 = vpop.permute.xlu2 %2077  ;;  %v4300_v13 = vpop.permute.xlu1 %1936 }
 0x2be   : > { %v2218_v30 = vmul.f32 %v4298_v1, %v2078_v8  ;;  %v1932_v16 = vpop.permute.xlu0 %1931 }
 0x2bf   : > { %v2004_v19 = vmul.f32 %v4174_v49, %v1932_v16 }
 0x2c0   : > { %v2246_v54 = vadd.f32 %v2218_v30, %v2015_v44  ;;  %v2024_v44 = vadd.f32 %v1996_v58, %v4138_v11 }
 0x2c1   : > { %v4311_v43 = vadd.f32 %v2004_v19, %v4115_v26 }
 0x2c2   : > { %v2278_v31 = vadd.f32 %v4306_v10, %v2246_v54 }
 0x2c4   : > { %v2306_v6 = vmax.f32 %v2278_v31, 0.0 }
 0x2c5   : > { %v2093_v48 = vpop.permute.xlu2 %2092  ;;  %v4316_v55 = vpop.permute.xlu1 %1951 }
 0x2c6   : > { %2335 = vst.msk [vmem:[#allocation2] sm:$0xff] %vm2334_vm0, %v2306_v6  ;;  %v2221_v32 = vmul.f32 %v4298_v1, %v2093_v48  ;;  %v1947_v51 = vpop.permute.xlu0 %1946 }
 0x2c7   : > { %v2007_v26 = vmul.f32 %v4174_v49, %v1947_v51 }
 0x2c8   : > { %v2249_v9 = vadd.f32 %v2221_v32, %v2018_v41  ;;  %v2027_v32 = vadd.f32 %v1999_v47, %v4153_v23  ;;  %v2002_v23 = vmul.f32 %v4174_v49, %v4283_v18 }
 0x2c9   : > { %v4324_v63 = vadd.f32 %v2007_v26, %v4130_v28 }
 0x2ca   : > { %v2281_v0 = vadd.f32 %v4306_v10, %v2249_v9  ;;  %v2030_v58 = vadd.f32 %v2002_v23, %v4168_v45 }
 0x2cc   : > { %v2309_v5 = vmax.f32 %v2281_v0, 0.0 }
 0x2cd   : > { %v2363_v29 = vld [vmem:[#allocation2] sm:$0xff]  ;;  %v2108_v42 = vpop.permute.xlu2 %2107  ;;  %v4334_v20 = vpop.permute.xlu1 %1966 }
 0x2ce   : > { %2365 = vst.msk [vmem:[%s4332_s20] sm:$0xff] %vm2334_vm0, %v2363_v29  ;;  %v2224_v28 = vmul.f32 %v4298_v1, %v2108_v42  ;;  %v1962_v62 = vpop.permute.xlu0 %1961 }
 0x2cf   : > { %2338 = vst.msk [vmem:[#allocation2 + $0x18] sm:$0xff] %vm2334_vm0, %v2309_v5  ;;  %v2010_v53 = vmul.f32 %v4174_v49, %v1962_v62 }
 0x2d0   : > { %v2252_v60 = vadd.f32 %v2224_v28, %v2021_v22 }
 0x2d1   : > { %v4343_v24 = vadd.f32 %v2010_v53, %v4145_v39 }
 0x2d2   : > { %v2284_v2 = vadd.f32 %v4306_v10, %v2252_v60 }
 0x2d4   : > { %v2312_v14 = vmax.f32 %v2284_v2, 0.0 }
 0x2d5   : > { %v2123_v3 = vpop.permute.xlu2 %2122  ;;  %v4348_v8 = vpop.permute.xlu1 %1981 }
 0x2d6   : > { %v2369_v30 = vld [vmem:[#allocation2 + $0x18] sm:$0x3f]  ;;  %2341 = vst.msk [vmem:[#allocation2 + $0x30] sm:$0xff] %vm2334_vm0, %v2312_v14  ;;  %v2227_v16 = vmul.f32 %v4298_v1, %v2123_v3  ;;  %v1977_v39 = vpop.permute.xlu0 %1976 }
 0x2d7   : > { %2786 = vst.msk [vmem:[%s4332_s20 + $0x18] sm:$0x3f] %vm2366_vm1, %v2369_v30  ;;  %v2013_v56 = vmul.f32 %v4174_v49, %v1977_v39  ;;  %v2005_v30 = vmul.f32 %v4174_v49, %v4300_v13 }
 0x2d8   : > { %v2255_v19 = vadd.f32 %v2227_v16, %v2024_v44 }
 0x2d9   : > { %v4357_v54 = vadd.f32 %v2013_v56, %v4160_v12 }
 0x2da   : > { %v2287_v11 = vadd.f32 %v4306_v10, %v2255_v19 }
 0x2dc   : > { %v2315_v31 = vmax.f32 %v2287_v11, 0.0 }
 0x2dd   : > { %v2378_v6 = vld [vmem:[#allocation2 + $0x30] sm:$0xff]  ;;  %v2138_v48 = vpop.permute.xlu2 %2137  ;;  %v2088_v41 = vpop.permute.xlu1 %2087 }
 0x2de   : > { %2789 = vst.msk [vmem:[%s4332_s20 + $0x30] sm:$0xff] %vm2334_vm0, %v2378_v6  ;;  %v2230_v51 = vmul.f32 %v4298_v1, %v2138_v48  ;;  %v2220_v26 = vmul.f32 %v4298_v1, %v2088_v41  ;;  %v2083_v9 = vpop.permute.xlu0 %2082 }
 0x2df   : > { %2344 = vst.msk [vmem:[#allocation2 + $0x48] sm:$0xff] %vm2334_vm0, %v2315_v31  ;;  %v2219_v12 = vmul.f32 %v4298_v1, %v2083_v9 }
 0x2e0   : > { %v2258_v38 = vadd.f32 %v2230_v51, %v2027_v32  ;;  %v2248_v21 = vadd.f32 %v2220_v26, %v4244_v40 }
 0x2e1   : > { %v2247_v0 = vadd.f32 %v2219_v12, %v4180_v33 }
 0x2e2   : > { %v2290_v5 = vadd.f32 %v4306_v10, %v2258_v38  ;;  %v2280_v29 = vadd.f32 %v4306_v10, %v2248_v21  ;;  %v2008_v38 = vmul.f32 %v4174_v49, %v4316_v55 }
 0x2e3   : > { %v2279_v42 = vadd.f32 %v4306_v10, %v2247_v0 }
 0x2e4   : > { %v2318_v22 = vmax.f32 %v2290_v5, 0.0  ;;  %v2308_v28 = vmax.f32 %v2280_v29, 0.0 }
 0x2e5   : > { %v2307_v62 = vmax.f32 %v2279_v42, 0.0  ;;  %v2153_v53 = vpop.permute.xlu2 %2152  ;;  %v2103_v60 = vpop.permute.xlu1 %2102 }
 0x2e6   : > { %v2384_v40 = vld [vmem:[#allocation2 + $0x48] sm:$0x3f]  ;;  %2347 = vst.msk [vmem:[#allocation2 + $0x60] sm:$0xff] %vm2334_vm0, %v2318_v22  ;;  %v2233_v33 = vmul.f32 %v4298_v1, %v2153_v53  ;;  %v2223_v18 = vmul.f32 %v4298_v1, %v2103_v60  ;;  %v2098_v2 = vpop.permute.xlu0 %2097 }
 0x2e7   : > { %2792 = vst.msk [vmem:[%s4332_s20 + $0x48] sm:$0x3f] %vm2366_vm1, %v2384_v40  ;;  %v2222_v14 = vmul.f32 %v4298_v1, %v2098_v2 }
 0x2e8   : > { %2337 = vst.msk [vmem:[#allocation2 + $0x10] sm:$0xff] %vm2334_vm0, %v2308_v28  ;;  %v2261_v3 = vadd.f32 %v2233_v33, %v2030_v58  ;;  %v2251_v44 = vadd.f32 %v2223_v18, %v4256_v27  ;;  %v2033_v27 = vadd.f32 %v2005_v30, %v4188_v50  ;;  %v2011_v18 = vmul.f32 %v4174_v49, %v4334_v20 }
 0x2e9   : > { %2336 = vst.msk [vmem:[#allocation2 + $0x8] sm:$0xff] %vm2334_vm0, %v2307_v62  ;;  %v2250_v45 = vadd.f32 %v2222_v14, %v4195_v35 }
 0x2ea   : > { %v2293_v16 = vadd.f32 %v4306_v10, %v2261_v3  ;;  %v2283_v39 = vadd.f32 %v4306_v10, %v2251_v44 }
 0x2eb   : > { %v2282_v56 = vadd.f32 %v4306_v10, %v2250_v45 }
 0x2ec   : > { %v2321_v19 = vmax.f32 %v2293_v16, 0.0  ;;  %v2311_v35 = vmax.f32 %v2283_v39, 0.0  ;;  %v2039_v16 = vadd.f32 %v2011_v18, %v4218_v46 }
 0x2ed   : > { %v2393_v47 = vld [vmem:[#allocation2 + $0x60] sm:$0xff]  ;;  %v2168_v11 = vpop.permute.xlu2 %2167  ;;  %v2118_v31 = vpop.permute.xlu1 %2117  ;;  %v2310_v32 = vmax.f32 %v2282_v56, 0.0 }
 0x2ee   : > { %2795 = vst.msk [vmem:[%s4332_s20 + $0x60] sm:$0xff] %vm2334_vm0, %v2393_v47  ;;  %v2236_v6 = vmul.f32 %v4298_v1, %v2168_v11  ;;  %v2226_v13 = vmul.f32 %v4298_v1, %v2118_v31  ;;  %v2113_v48 = vpop.permute.xlu0 %2112 }
 0x2ef   : > { %v2368_v41 = vld [vmem:[#allocation2 + $0x10] sm:$0xff]  ;;  %2350 = vst.msk [vmem:[#allocation2 + $0x78] sm:$0xff] %vm2334_vm0, %v2321_v19  ;;  %v2225_v51 = vmul.f32 %v4298_v1, %v2113_v48 }
 0x2f0   : > { %2785 = vst.msk [vmem:[%s4332_s20 + $0x10] sm:$0xff] %vm2334_vm0, %v2368_v41  ;;  %v2364_v26 = vld [vmem:[#allocation2 + $0x8] sm:$0x3f]  ;;  %v2264_v9 = vadd.f32 %v2236_v6, %v2033_v27  ;;  %v2254_v50 = vadd.f32 %v2226_v13, %v4270_v7  ;;  %v2014_v13 = vmul.f32 %v4174_v49, %v4348_v8 }
 0x2f1   : > { %2367 = vst.msk [vmem:[%s4332_s20 + $0x8] sm:$0x3f] %vm2366_vm1, %v2364_v26  ;;  %v2253_v12 = vadd.f32 %v2225_v51, %v4210_v34  ;;  %v2036_v34 = vadd.f32 %v2008_v38, %v4203_v36 }
 0x2f2   : > { %2340 = vst.msk [vmem:[#allocation2 + $0x28] sm:$0xff] %vm2334_vm0, %v2311_v35  ;;  %v2296_v21 = vadd.f32 %v4306_v10, %v2264_v9  ;;  %v2286_v0 = vadd.f32 %v4306_v10, %v2254_v50  ;;  %v2042_v50 = vadd.f32 %v2014_v13, %v4231_v17 }
 0x2f3   : > { %2339 = vst.msk [vmem:[#allocation2 + $0x20] sm:$0xff] %vm2334_vm0, %v2310_v32  ;;  %v2285_v23 = vadd.f32 %v4306_v10, %v2253_v12 }
 0x2f4   : > { %v2324_v5 = vmax.f32 %v2296_v21, 0.0  ;;  %v2314_v7 = vmax.f32 %v2286_v0, 0.0 }
 0x2f5   : > { %v2313_v29 = vmax.f32 %v2285_v23, 0.0  ;;  %v2183_v42 = vpop.permute.xlu2 %2182  ;;  %v2133_v22 = vpop.permute.xlu1 %2132 }
 0x2f6   : > { %v2399_v55 = vld [vmem:[#allocation2 + $0x78] sm:$0x3f]  ;;  %2353 = vst.msk [vmem:[#allocation2 + $0x90] sm:$0xff] %vm2334_vm0, %v2324_v5  ;;  %v2239_v28 = vmul.f32 %v4298_v1, %v2183_v42  ;;  %v2229_v62 = vmul.f32 %v4298_v1, %v2133_v22  ;;  %v2128_v53 = vpop.permute.xlu0 %2127 }
 0x2f7   : > { %2798 = vst.msk [vmem:[%s4332_s20 + $0x78] sm:$0x3f] %vm2366_vm1, %v2399_v55  ;;  %v2228_v60 = vmul.f32 %v4298_v1, %v2128_v53 }
 0x2f8   : > { %2343 = vst.msk [vmem:[#allocation2 + $0x40] sm:$0xff] %vm2334_vm0, %v2314_v7  ;;  %v2267_v58 = vadd.f32 %v2239_v28, %v2036_v34  ;;  %v2257_v40 = vadd.f32 %v2229_v62, %v4281_v37 }
 0x2f9   : > { %v2374_v36 = vld [vmem:[#allocation2 + $0x28] sm:$0x3f]  ;;  %2342 = vst.msk [vmem:[#allocation2 + $0x38] sm:$0xff] %vm2334_vm0, %v2313_v29  ;;  %v2256_v33 = vadd.f32 %v2228_v60, %v4226_v57 }
 0x2fa   : > { %2788 = vst.msk [vmem:[%s4332_s20 + $0x28] sm:$0x3f] %vm2366_vm1, %v2374_v36  ;;  %v2373_v2 = vld [vmem:[#allocation2 + $0x20] sm:$0xff]  ;;  %v2299_v14 = vadd.f32 %v4306_v10, %v2267_v58  ;;  %v2289_v3 = vadd.f32 %v4306_v10, %v2257_v40 }
 0x2fb   : > { %2787 = vst.msk [vmem:[%s4332_s20 + $0x20] sm:$0xff] %vm2334_vm0, %v2373_v2  ;;  %v2288_v37 = vadd.f32 %v4306_v10, %v2256_v33 }
 0x2fc   : > { %v2327_v44 = vmax.f32 %v2299_v14, 0.0  ;;  %v2317_v20 = vmax.f32 %v2289_v3, 0.0 }
 0x2fd   : > { %v2408_v45 = vld [vmem:[#allocation2 + $0x90] sm:$0xff]  ;;  %v2198_v30 = vpop.permute.xlu2 %2197  ;;  %v2148_v57 = vpop.permute.xlu1 %2147  ;;  %v2316_v11 = vmax.f32 %v2288_v37, 0.0 }
 0x2fe   : > { %2801 = vst.msk [vmem:[%s4332_s20 + $0x90] sm:$0xff] %vm2334_vm0, %v2408_v45  ;;  %v2242_v39 = vmul.f32 %v4298_v1, %v2198_v30  ;;  %v2232_v56 = vmul.f32 %v4298_v1, %v2148_v57  ;;  %v2143_v19 = vpop.permute.xlu0 %2142 }
 0x2ff   : > { %v2383_v47 = vld [vmem:[#allocation2 + $0x40] sm:$0xff]  ;;  %2356 = vst.msk [vmem:[#allocation2 + $0xa8] sm:$0xff] %vm2334_vm0, %v2327_v44  ;;  %v2231_v31 = vmul.f32 %v4298_v1, %v2143_v19 }
 0x300   : > { %2791 = vst.msk [vmem:[%s4332_s20 + $0x40] sm:$0xff] %vm2334_vm0, %v2383_v47  ;;  %v2379_v27 = vld [vmem:[#allocation2 + $0x38] sm:$0x3f]  ;;  %v2270_v35 = vadd.f32 %v2242_v39, %v2039_v16  ;;  %v2260_v46 = vadd.f32 %v2232_v56, %v4291_v61 }
 0x301   : > { %2790 = vst.msk [vmem:[%s4332_s20 + $0x38] sm:$0x3f] %vm2366_vm1, %v2379_v27  ;;  %v2259_v6 = vadd.f32 %v2231_v31, %v4239_v59 }
 0x302   : > { %2346 = vst.msk [vmem:[#allocation2 + $0x58] sm:$0xff] %vm2334_vm0, %v2317_v20  ;;  %v2302_v48 = vadd.f32 %v4306_v10, %v2270_v35  ;;  %v2292_v41 = vadd.f32 %v4306_v10, %v2260_v46 }
 0x303   : > { %2345 = vst.msk [vmem:[#allocation2 + $0x50] sm:$0xff] %vm2334_vm0, %v2316_v11  ;;  %v2291_v32 = vadd.f32 %v4306_v10, %v2259_v6 }
 0x304   : > { %v2330_v51 = vmax.f32 %v2302_v48, 0.0  ;;  %v2320_v61 = vmax.f32 %v2292_v41, 0.0 }
 0x305   : > { %v2319_v26 = vmax.f32 %v2291_v32, 0.0  ;;  %v2213_v9 = vpop.permute.xlu2 %2212  ;;  %v2163_v59 = vpop.permute.xlu1 %2162 }
 0x306   : > { %v2414_v49 = vld [vmem:[#allocation2 + $0xa8] sm:$0x3f]  ;;  %2359 = vst.msk [vmem:[#allocation2 + $0xc0] sm:$0xff] %vm2334_vm0, %v2330_v51  ;;  %v2245_v8 = vmul.f32 %v4298_v1, %v2213_v9  ;;  %v2235_v12 = vmul.f32 %v4298_v1, %v2163_v59  ;;  %v2158_v38 = vpop.permute.xlu0 %2157 }
 0x307   : > { %2804 = vst.msk [vmem:[%s4332_s20 + $0xa8] sm:$0x3f] %vm2366_vm1, %v2414_v49  ;;  %v2234_v21 = vmul.f32 %v4298_v1, %v2158_v38 }
 0x308   : > { %2349 = vst.msk [vmem:[#allocation2 + $0x70] sm:$0xff] %vm2334_vm0, %v2320_v61  ;;  %v2273_v0 = vadd.f32 %v2245_v8, %v2042_v50  ;;  %v2263_v23 = vadd.f32 %v2235_v12, %v4311_v43 }
 0x309   : > { %v2389_v17 = vld [vmem:[#allocation2 + $0x58] sm:$0x3f]  ;;  %2348 = vst.msk [vmem:[#allocation2 + $0x68] sm:$0xff] %vm2334_vm0, %v2319_v26  ;;  %v2262_v5 = vadd.f32 %v2234_v21, %v4252_v4 }
 0x30a   : > { %2794 = vst.msk [vmem:[%s4332_s20 + $0x58] sm:$0x3f] %vm2366_vm1, %v2389_v17  ;;  %v2388_v7 = vld [vmem:[#allocation2 + $0x50] sm:$0xff]  ;;  %v2305_v29 = vadd.f32 %v4306_v10, %v2273_v0  ;;  %v2295_v42 = vadd.f32 %v4306_v10, %v2263_v23 }
 0x30b   : > { %2793 = vst.msk [vmem:[%s4332_s20 + $0x50] sm:$0xff] %vm2334_vm0, %v2388_v7  ;;  %v2294_v22 = vadd.f32 %v4306_v10, %v2262_v5 }
 0x30c   : > { %v2333_v34 = vmax.f32 %v2305_v29, 0.0  ;;  %v2323_v28 = vmax.f32 %v2295_v42, 0.0 }
 0x30d   : > { %v2423_v43 = vld [vmem:[#allocation2 + $0xc0] sm:$0xff]  ;;  %v2178_v55 = vpop.permute.xlu1 %2177  ;;  %v2322_v60 = vmax.f32 %v2294_v22, 0.0 }
 0x30e   : > { %2807 = vst.msk [vmem:[%s4332_s20 + $0xc0] sm:$0xff] %vm2334_vm0, %v2423_v43  ;;  %v2238_v4 = vmul.f32 %v4298_v1, %v2178_v55  ;;  %v2173_v62 = vpop.permute.xlu0 %2172 }
 0x30f   : > { %v2398_v53 = vld [vmem:[#allocation2 + $0x70] sm:$0xff]  ;;  %2362 = vst.msk [vmem:[#allocation2 + $0xd8] sm:$0xff] %vm2334_vm0, %v2333_v34  ;;  %v2237_v58 = vmul.f32 %v4298_v1, %v2173_v62 }
 0x310   : > { %2797 = vst.msk [vmem:[%s4332_s20 + $0x70] sm:$0xff] %vm2334_vm0, %v2398_v53  ;;  %v2394_v40 = vld [vmem:[#allocation2 + $0x68] sm:$0x3f]  ;;  %v2266_v36 = vadd.f32 %v2238_v4, %v4324_v63 }
 0x311   : > { %2796 = vst.msk [vmem:[%s4332_s20 + $0x68] sm:$0x3f] %vm2366_vm1, %v2394_v40  ;;  %v2265_v33 = vadd.f32 %v2237_v58, %v4265_v15 }
 0x312   : > { %2352 = vst.msk [vmem:[#allocation2 + $0x88] sm:$0xff] %vm2334_vm0, %v2323_v28  ;;  %v2298_v18 = vadd.f32 %v4306_v10, %v2266_v36 }
 0x313   : > { %2351 = vst.msk [vmem:[#allocation2 + $0x80] sm:$0xff] %vm2334_vm0, %v2322_v60  ;;  %v2297_v2 = vadd.f32 %v4306_v10, %v2265_v33 }
 0x314   : > { %v2326_v14 = vmax.f32 %v2298_v18, 0.0 }
 0x315   : > { %v2325_v3 = vmax.f32 %v2297_v2, 0.0  ;;  %v2193_v37 = vpop.permute.xlu1 %2192 }
 0x316   : > { %v2429_v44 = vld [vmem:[#allocation2 + $0xd8] sm:$0x3f]  ;;  %2355 = vst.msk [vmem:[#allocation2 + $0xa0] sm:$0xff] %vm2334_vm0, %v2326_v14  ;;  %v2241_v63 = vmul.f32 %v4298_v1, %v2193_v37  ;;  %v2188_v45 = vpop.permute.xlu0 %2187 }
 0x317   : > { %2810 = vst.msk [vmem:[%s4332_s20 + $0xd8] sm:$0x3f] %vm2366_vm1, %v2429_v44  ;;  %v2240_v15 = vmul.f32 %v4298_v1, %v2188_v45 }
 0x318   : > { %2354 = vst.msk [vmem:[#allocation2 + $0x98] sm:$0xff] %vm2334_vm0, %v2325_v3  ;;  %v2269_v30 = vadd.f32 %v2241_v63, %v4343_v24 }
 0x319   : > { %v2404_v57 = vld [vmem:[#allocation2 + $0x88] sm:$0x3f]  ;;  %v2268_v16 = vadd.f32 %v2240_v15, %v4278_v52 }
 0x31a   : > { %2800 = vst.msk [vmem:[%s4332_s20 + $0x88] sm:$0x3f] %vm2366_vm1, %v2404_v57  ;;  %v2403_v20 = vld [vmem:[#allocation2 + $0x80] sm:$0xff]  ;;  %v2301_v39 = vadd.f32 %v4306_v10, %v2269_v30 }
 0x31b   : > { %2799 = vst.msk [vmem:[%s4332_s20 + $0x80] sm:$0xff] %vm2334_vm0, %v2403_v20  ;;  %v2300_v56 = vadd.f32 %v4306_v10, %v2268_v16 }
 0x31c   : > { %v2329_v19 = vmax.f32 %v2301_v39, 0.0 }
 0x31d   : > { %v2413_v47 = vld [vmem:[#allocation2 + $0xa0] sm:$0xff]  ;;  %v2328_v11 = vmax.f32 %v2300_v56, 0.0  ;;  %v2208_v31 = vpop.permute.xlu1 %2207 }
 0x31e   : > { %2803 = vst.msk [vmem:[%s4332_s20 + $0xa0] sm:$0xff] %vm2334_vm0, %v2413_v47  ;;  %v2244_v24 = vmul.f32 %v4298_v1, %v2208_v31  ;;  %v2203_v52 = vpop.permute.xlu0 %2202 }
 0x31f   : > { %v2409_v27 = vld [vmem:[#allocation2 + $0x98] sm:$0x3f]  ;;  %2358 = vst.msk [vmem:[#allocation2 + $0xb8] sm:$0xff] %vm2334_vm0, %v2329_v19  ;;  %v2243_v35 = vmul.f32 %v4298_v1, %v2203_v52 }
 0x320   : > { %2802 = vst.msk [vmem:[%s4332_s20 + $0x98] sm:$0x3f] %vm2366_vm1, %v2409_v27  ;;  %v2272_v46 = vadd.f32 %v2244_v24, %v4357_v54 }
 0x321   : > { %2357 = vst.msk [vmem:[#allocation2 + $0xb0] sm:$0xff] %vm2334_vm0, %v2328_v11  ;;  %v2271_v6 = vadd.f32 %v2243_v35, %v4288_v25 }
 0x322   : > { %v2304_v13 = vadd.f32 %v4306_v10, %v2272_v46 }
 0x323   : > { %v2303_v48 = vadd.f32 %v4306_v10, %v2271_v6 }
 0x324   : > { %v2332_v41 = vmax.f32 %v2304_v13, 0.0 }
 0x325   : > { %v2331_v32 = vmax.f32 %v2303_v48, 0.0 }
 0x326   : > { %v2419_v51 = vld [vmem:[#allocation2 + $0xb8] sm:$0x3f]  ;;  %2361 = vst.msk [vmem:[#allocation2 + $0xd0] sm:$0xff] %vm2334_vm0, %v2332_v41 }
 0x327   : > { %2806 = vst.msk [vmem:[%s4332_s20 + $0xb8] sm:$0x3f] %vm2366_vm1, %v2419_v51 }
 0x328   : > { %v2418_v1 = vld [vmem:[#allocation2 + $0xb0] sm:$0xff]  ;;  %2360 = vst.msk [vmem:[#allocation2 + $0xc8] sm:$0xff] %vm2334_vm0, %v2331_v32 }
 0x329   : > { %2805 = vst.msk [vmem:[%s4332_s20 + $0xb0] sm:$0xff] %vm2334_vm0, %v2418_v1 }
 0x32d   : > { %v2428_v54 = vld [vmem:[#allocation2 + $0xd0] sm:$0xff] }
 0x32e   : > { %2809 = vst.msk [vmem:[%s4332_s20 + $0xd0] sm:$0xff] %vm2334_vm0, %v2428_v54 }
 0x32f   : > { %v2424_v25 = vld [vmem:[#allocation2 + $0xc8] sm:$0x3f] }
 0x330   : > { %2808 = vst.msk [vmem:[%s4332_s20 + $0xc8] sm:$0x3f] %vm2366_vm1, %v2424_v25 }
 0x331 PF: > { %s13_s14 = sadd.s32 1, %s2879_s14   ;;  %s4772_s12 = smov %s2875_s13 }
 0x332   : > { %p10_p5 = scmp.ge.s32.totalorder %s13_s14, 4   ;;  %s4773_s13 = smov %s4775_s15 }
 0x334   :  { %12 = sbr.rel (!%p10_p5) target bundleno = 2 (0x2), region = 92 }

</bundles_post_ra>
